<compile_context>
chip_gen: v7x
topology: tpu7x:2x2x1
jax: 0.10.0
libtpu: 0.0.40
codegen_flags: <defaults>
</compile_context>

<pallas_src>
import functools
import math

import numpy as np

import jax
import jax.numpy as jnp
from jax.experimental import pallas as pl
from jax.experimental.pallas import tpu as pltpu


# ----------------------------------------------------------------------------
# Static "same"-padding tap masks over the flattened per-image (h, w) lane axis
# ----------------------------------------------------------------------------
def _make_tap_masks(H, W):
    """(9, H*W) float32 {0,1}: validity of each 3x3 tap's source pixel."""
    o = np.arange(H * W)
    hh, ww = o // W, o % W
    m = np.zeros((9, H * W), np.float32)
    for ky in range(3):
        for kx in range(3):
            valid = ((hh + ky - 1 >= 0) & (hh + ky - 1 < H) &
                     (ww + kx - 1 >= 0) & (ww + kx - 1 < W))
            m[ky * 3 + kx] = valid.astype(np.float32)
    return m


# ----------------------------------------------------------------------------
# One Conv3x3("same") + BatchNorm(train) + ReLU stage, fully in vregs
# ----------------------------------------------------------------------------
def _conv3x3_bn_relu(x2d, w9, gamma, beta, masks, N, H, W):
    """
    x2d:   (N*Cin, H*W)   activations, one image plane per row (lane = h*W+w)
    w9:    (9, Cout, Cin) conv weights, tap-major (ky*3+kx)
    gamma: (Cout, 1), beta: (Cout, 1)  BN affine parameters
    masks: (9, H*W)       {0,1} f32 boundary masks
    returns (N*Cout, H*W) float32
    """
    HW = H * W
    cin = x2d.shape[0] // N
    cout = w9.shape[1]
    zblk = jnp.zeros((cout, cin), jnp.float32)

    acc = jnp.zeros((N * cout, HW), jnp.float32)
    for ky in range(3):
        rhs_parts = []   # kx-shifted activation slabs stacked on the K axis
        lhs_parts = []   # matching batch-block-diagonal weight blocks
        for kx in range(3):
            t = ky * 3 + kx
            d = (ky - 1) * W + (kx - 1)        # lane offset of the tap source
            xt = x2d if d == 0 else jnp.roll(x2d, -d, axis=1)
            if not (ky == 1 and kx == 1):      # zero wrap-around / halo reads
                xt = xt * masks[t:t + 1]       # (1, HW) broadcast, VPU mul
            rhs_parts.append(xt)
            wt = w9[t]                          # (Cout, Cin)
            # block-diagonal over the batch so one matmul handles all images
            lhs_parts.append(jnp.concatenate(
                [jnp.concatenate([wt if j == i else zblk for j in range(N)],
                                 axis=1) for i in range(N)], axis=0))
        rhs = jnp.concatenate(rhs_parts, axis=0)        # (3*N*Cin, H*W)
        lhs = jnp.concatenate(lhs_parts, axis=1)        # (N*Cout, 3*N*Cin)
        acc = acc + jnp.dot(lhs, rhs, preferred_element_type=jnp.float32)

    # BatchNorm2d, training-mode batch statistics (biased variance, eps=1e-5),
    # single pass with folded affine.  (Conv bias omitted: cancels under the
    # batch-mean subtraction.)
    cnt = float(N * HW)
    s1 = jnp.sum(acc, axis=1, keepdims=True)            # (N*Cout, 1)
    s2 = jnp.sum(acc * acc, axis=1, keepdims=True)
    t1, t2 = s1, s2
    for j in range(1, N):                                # fold batch groups
        t1 = t1 + jnp.roll(s1, j * cout, axis=0)
        t2 = t2 + jnp.roll(s2, j * cout, axis=0)
    mean = t1 * (1.0 / cnt)
    var = t2 * (1.0 / cnt) - mean * mean
    g_rows = jnp.concatenate([gamma] * N, axis=0)        # (N*Cout, 1)
    b_rows = jnp.concatenate([beta] * N, axis=0)
    scale = g_rows * jax.lax.rsqrt(var + 1e-5)
    shift = b_rows - mean * scale
    return jnp.maximum(acc * scale + shift, 0.0)         # ReLU


# ----------------------------------------------------------------------------
# Fused DoubleConv kernel
# ----------------------------------------------------------------------------
def double_conv_kernel(masks_ref, x_ref, w1_ref, g1_ref, b1_ref,
                       w2_ref, g2_ref, b2_ref, o_ref, *, N, H, W):
    masks = masks_ref[...]                               # (9, H*W)
    y1 = _conv3x3_bn_relu(x_ref[...], w1_ref[...], g1_ref[...], b1_ref[...],
                          masks, N, H, W)
    y2 = _conv3x3_bn_relu(y1, w2_ref[...], g2_ref[...], b2_ref[...],
                          masks, N, H, W)
    o_ref[...] = y2.astype(o_ref.dtype)                  # (N*Cout, H*W) store


# ----------------------------------------------------------------------------
# Wrapper: only free reshapes around a single un-pipelined pallas_call
# ----------------------------------------------------------------------------
@jax.jit
def double_conv(x_nchw, params):
    N, Cin, H, W = x_nchw.shape
    Cout = params["w1"].shape[1]
    x2d = x_nchw.reshape(N * Cin, H * W)                 # free view of NCHW
    masks = jnp.asarray(_make_tap_masks(H, W))           # compile-time constant

    vmem = pl.BlockSpec(memory_space=pltpu.MemorySpace.VMEM)
    out2d = pl.pallas_call(
        functools.partial(double_conv_kernel, N=N, H=H, W=W),
        out_shape=jax.ShapeDtypeStruct((N * Cout, H * W), x_nchw.dtype),
        in_specs=[vmem] * 8,
        out_specs=vmem,
    )(masks, x2d, params["w1"], params["g1"], params["be1"],
      params["w2"], params["g2"], params["be2"])

    return out2d.reshape(N, Cout, H, W)                  # free view, NCHW out


# ----------------------------------------------------------------------------
# Parameter construction (deterministic, PyTorch-like init)
# ----------------------------------------------------------------------------
def make_conv_params(key, cin, cout, k=3):
    kw, kb = jax.random.split(key)
    fan_in = cin * k * k
    bound = 1.0 / math.sqrt(fan_in)
    # kernel layout: (9, Cout, Cin), tap-major (ky*3 + kx)
    w = jax.random.uniform(kw, (k * k, cout, cin), minval=-bound, maxval=bound,
                           dtype=jnp.float32)
    b = jax.random.uniform(kb, (cout,), minval=-bound, maxval=bound,
                           dtype=jnp.float32)
    return w, b


# ----------------------------------------------------------------------------
# Pure-JAX reference (keeps the conv bias; the kernel drops it because it
# cancels under training-mode BN — matching outputs validate that claim).
# ----------------------------------------------------------------------------
def reference_forward(x_nchw, params):
    x = jnp.transpose(x_nchw, (0, 2, 3, 1))              # NCHW -> NHWC
    stages = ((params["w1"], params["b1"], params["g1"], params["be1"]),
              (params["w2"], params["b2"], params["g2"], params["be2"]))
    for (w9, b, g, be) in stages:
        cout, cin = w9.shape[1], w9.shape[2]
        w_hwio = jnp.transpose(w9.reshape(3, 3, cout, cin), (0, 1, 3, 2))
        y = jax.lax.conv_general_dilated(
            x, w_hwio, window_strides=(1, 1), padding="SAME",
            dimension_numbers=("NHWC", "HWIO", "NHWC")) + b
        mean = jnp.mean(y, axis=(0, 1, 2), keepdims=True)
        var = jnp.mean((y - mean) ** 2, axis=(0, 1, 2), keepdims=True)
        y = (y - mean) * jax.lax.rsqrt(var + 1e-5)
        x = jnp.maximum(y * g.reshape(-1) + be.reshape(-1), 0.0)
    return jnp.transpose(x, (0, 3, 1, 2))


# ----------------------------------------------------------------------------
if __name__ == "__main__":
    # TODO(synk): BatchNorm2d running-stats update (training-time side effect)
    # is not materialized; only the forward activations are produced.
    in_channels, out_channels = 4, 8
    N, H, W = 2, 16, 16

    key = jax.random.PRNGKey(0)
    kx, k1, k2 = jax.random.split(key, 3)

    x = jax.random.normal(kx, (N, in_channels, H, W), dtype=jnp.float32)

    w1, b1 = make_conv_params(k1, in_channels, out_channels)
    w2, b2 = make_conv_params(k2, out_channels, out_channels)
    params = dict(
        w1=w1, b1=b1,
        g1=jnp.ones((out_channels, 1), jnp.float32),
        be1=jnp.zeros((out_channels, 1), jnp.float32),
        w2=w2, b2=b2,
        g2=jnp.ones((out_channels, 1), jnp.float32),
        be2=jnp.zeros((out_channels, 1), jnp.float32),
    )

    out = jax.block_until_ready(double_conv(x, params))
    ref = reference_forward(x, params)

    assert out.shape == (N, out_channels, H, W)
    assert jnp.allclose(out, ref, atol=1e-3, rtol=1e-3), "mismatch vs reference"

    print("KERNEL_OK")
</pallas_src>

<mosaic_0001>
module attributes {stable_mosaic.version = 11 : i64} {
  func.func @double_conv_kernel(%arg0: memref<9x256xf32, #tpu.memory_space<vmem>>, %arg1: memref<8x256xf32, #tpu.memory_space<vmem>>, %arg2: memref<9x8x4xf32, #tpu.memory_space<vmem>>, %arg3: memref<8x1xf32, #tpu.memory_space<vmem>>, %arg4: memref<8x1xf32, #tpu.memory_space<vmem>>, %arg5: memref<9x8x8xf32, #tpu.memory_space<vmem>>, %arg6: memref<8x1xf32, #tpu.memory_space<vmem>>, %arg7: memref<8x1xf32, #tpu.memory_space<vmem>>, %arg8: memref<16x256xf32, #tpu.memory_space<vmem>>) attributes {dimension_semantics = [], scalar_prefetch = 0 : i64, scratch_operands = 0 : i64, tpu.core_type = #tpu.core_type<tc>} {
    %c0 = arith.constant 0 : index
    %c0_0 = arith.constant 0 : index
    %0 = vector.load %arg0[%c0, %c0_0] : memref<9x256xf32, #tpu.memory_space<vmem>>, vector<9x256xf32>
    %c0_1 = arith.constant 0 : index
    %c0_2 = arith.constant 0 : index
    %1 = vector.load %arg1[%c0_1, %c0_2] : memref<8x256xf32, #tpu.memory_space<vmem>>, vector<8x256xf32>
    %c0_3 = arith.constant 0 : index
    %c0_4 = arith.constant 0 : index
    %c0_5 = arith.constant 0 : index
    %2 = vector.load %arg2[%c0_3, %c0_4, %c0_5] : memref<9x8x4xf32, #tpu.memory_space<vmem>>, vector<9x8x4xf32>
    %c0_6 = arith.constant 0 : index
    %c0_7 = arith.constant 0 : index
    %3 = vector.load %arg3[%c0_6, %c0_7] : memref<8x1xf32, #tpu.memory_space<vmem>>, vector<8x1xf32>
    %c0_8 = arith.constant 0 : index
    %c0_9 = arith.constant 0 : index
    %4 = vector.load %arg4[%c0_8, %c0_9] : memref<8x1xf32, #tpu.memory_space<vmem>>, vector<8x1xf32>
    %cst = arith.constant 0.000000e+00 : f32
    %5 = vector.broadcast %cst : f32 to vector<8x4xf32>
    %cst_10 = arith.constant 0.000000e+00 : f32
    %6 = vector.broadcast %cst_10 : f32 to vector<16x256xf32>
    %7 = vector.extract_strided_slice %1 {offsets = [0, 239], sizes = [8, 17], strides = [1, 1]} : vector<8x256xf32> to vector<8x17xf32>
    %8 = vector.extract_strided_slice %1 {offsets = [0, 0], sizes = [8, 239], strides = [1, 1]} : vector<8x256xf32> to vector<8x239xf32>
    %9 = tpu.concatenate %7, %8 in 1 : vector<8x17xf32>, vector<8x239xf32> -> vector<8x256xf32>
    %10 = vector.extract_strided_slice %0 {offsets = [0, 0], sizes = [1, 256], strides = [1, 1]} : vector<9x256xf32> to vector<1x256xf32>
    %11 = vector.broadcast %10 : vector<1x256xf32> to vector<8x256xf32>
    %12 = arith.mulf %9, %11 : vector<8x256xf32>
    %13 = vector.extract_strided_slice %2 {offsets = [0, 0, 0], sizes = [1, 8, 4], strides = [1, 1, 1]} : vector<9x8x4xf32> to vector<1x8x4xf32>
    %14 = vector.shape_cast %13 : vector<1x8x4xf32> to vector<8x4xf32>
    %15 = tpu.concatenate %14, %5 in 1 : vector<8x4xf32>, vector<8x4xf32> -> vector<8x8xf32>
    %16 = tpu.concatenate %5, %14 in 1 : vector<8x4xf32>, vector<8x4xf32> -> vector<8x8xf32>
    %17 = tpu.concatenate %15, %16 in 0 : vector<8x8xf32>, vector<8x8xf32> -> vector<16x8xf32>
    %18 = vector.extract_strided_slice %1 {offsets = [0, 240], sizes = [8, 16], strides = [1, 1]} : vector<8x256xf32> to vector<8x16xf32>
    %19 = vector.extract_strided_slice %1 {offsets = [0, 0], sizes = [8, 240], strides = [1, 1]} : vector<8x256xf32> to vector<8x240xf32>
    %20 = tpu.concatenate %18, %19 in 1 : vector<8x16xf32>, vector<8x240xf32> -> vector<8x256xf32>
    %21 = vector.extract_strided_slice %0 {offsets = [1, 0], sizes = [1, 256], strides = [1, 1]} : vector<9x256xf32> to vector<1x256xf32>
    %22 = vector.broadcast %21 : vector<1x256xf32> to vector<8x256xf32>
    %23 = arith.mulf %20, %22 : vector<8x256xf32>
    %24 = vector.extract_strided_slice %2 {offsets = [1, 0, 0], sizes = [1, 8, 4], strides = [1, 1, 1]} : vector<9x8x4xf32> to vector<1x8x4xf32>
    %25 = vector.shape_cast %24 : vector<1x8x4xf32> to vector<8x4xf32>
    %26 = tpu.concatenate %25, %5 in 1 : vector<8x4xf32>, vector<8x4xf32> -> vector<8x8xf32>
    %27 = tpu.concatenate %5, %25 in 1 : vector<8x4xf32>, vector<8x4xf32> -> vector<8x8xf32>
    %28 = tpu.concatenate %26, %27 in 0 : vector<8x8xf32>, vector<8x8xf32> -> vector<16x8xf32>
    %29 = vector.extract_strided_slice %1 {offsets = [0, 241], sizes = [8, 15], strides = [1, 1]} : vector<8x256xf32> to vector<8x15xf32>
    %30 = vector.extract_strided_slice %1 {offsets = [0, 0], sizes = [8, 241], strides = [1, 1]} : vector<8x256xf32> to vector<8x241xf32>
    %31 = tpu.concatenate %29, %30 in 1 : vector<8x15xf32>, vector<8x241xf32> -> vector<8x256xf32>
    %32 = vector.extract_strided_slice %0 {offsets = [2, 0], sizes = [1, 256], strides = [1, 1]} : vector<9x256xf32> to vector<1x256xf32>
    %33 = vector.broadcast %32 : vector<1x256xf32> to vector<8x256xf32>
    %34 = arith.mulf %31, %33 : vector<8x256xf32>
    %35 = vector.extract_strided_slice %2 {offsets = [2, 0, 0], sizes = [1, 8, 4], strides = [1, 1, 1]} : vector<9x8x4xf32> to vector<1x8x4xf32>
    %36 = vector.shape_cast %35 : vector<1x8x4xf32> to vector<8x4xf32>
    %37 = tpu.concatenate %36, %5 in 1 : vector<8x4xf32>, vector<8x4xf32> -> vector<8x8xf32>
    %38 = tpu.concatenate %5, %36 in 1 : vector<8x4xf32>, vector<8x4xf32> -> vector<8x8xf32>
    %39 = tpu.concatenate %37, %38 in 0 : vector<8x8xf32>, vector<8x8xf32> -> vector<16x8xf32>
    %40 = tpu.concatenate %12, %23, %34 in 0 : vector<8x256xf32>, vector<8x256xf32>, vector<8x256xf32> -> vector<24x256xf32>
    %41 = tpu.concatenate %17, %28, %39 in 1 : vector<16x8xf32>, vector<16x8xf32>, vector<16x8xf32> -> vector<16x24xf32>
    %cst_11 = arith.constant dense<0.000000e+00> : vector<16x256xf32>
    %42 = tpu.matmul %41, %40, %cst_11 {dimension_numbers = #tpu.dot_dimension_numbers<[1], [0], [0], [1], [0, 0, 1, 1], [], []>} : vector<16x24xf32>, vector<24x256xf32>, vector<16x256xf32> -> vector<16x256xf32>
    %43 = arith.addf %6, %42 : vector<16x256xf32>
    %44 = vector.extract_strided_slice %1 {offsets = [0, 255], sizes = [8, 1], strides = [1, 1]} : vector<8x256xf32> to vector<8x1xf32>
    %45 = vector.extract_strided_slice %1 {offsets = [0, 0], sizes = [8, 255], strides = [1, 1]} : vector<8x256xf32> to vector<8x255xf32>
    %46 = tpu.concatenate %44, %45 in 1 : vector<8x1xf32>, vector<8x255xf32> -> vector<8x256xf32>
    %47 = vector.extract_strided_slice %0 {offsets = [3, 0], sizes = [1, 256], strides = [1, 1]} : vector<9x256xf32> to vector<1x256xf32>
    %48 = vector.broadcast %47 : vector<1x256xf32> to vector<8x256xf32>
    %49 = arith.mulf %46, %48 : vector<8x256xf32>
    %50 = vector.extract_strided_slice %2 {offsets = [3, 0, 0], sizes = [1, 8, 4], strides = [1, 1, 1]} : vector<9x8x4xf32> to vector<1x8x4xf32>
    %51 = vector.shape_cast %50 : vector<1x8x4xf32> to vector<8x4xf32>
    %52 = tpu.concatenate %51, %5 in 1 : vector<8x4xf32>, vector<8x4xf32> -> vector<8x8xf32>
    %53 = tpu.concatenate %5, %51 in 1 : vector<8x4xf32>, vector<8x4xf32> -> vector<8x8xf32>
    %54 = tpu.concatenate %52, %53 in 0 : vector<8x8xf32>, vector<8x8xf32> -> vector<16x8xf32>
    %55 = vector.extract_strided_slice %2 {offsets = [4, 0, 0], sizes = [1, 8, 4], strides = [1, 1, 1]} : vector<9x8x4xf32> to vector<1x8x4xf32>
    %56 = vector.shape_cast %55 : vector<1x8x4xf32> to vector<8x4xf32>
    %57 = tpu.concatenate %56, %5 in 1 : vector<8x4xf32>, vector<8x4xf32> -> vector<8x8xf32>
    %58 = tpu.concatenate %5, %56 in 1 : vector<8x4xf32>, vector<8x4xf32> -> vector<8x8xf32>
    %59 = tpu.concatenate %57, %58 in 0 : vector<8x8xf32>, vector<8x8xf32> -> vector<16x8xf32>
    %60 = vector.extract_strided_slice %1 {offsets = [0, 1], sizes = [8, 255], strides = [1, 1]} : vector<8x256xf32> to vector<8x255xf32>
    %61 = vector.extract_strided_slice %1 {offsets = [0, 0], sizes = [8, 1], strides = [1, 1]} : vector<8x256xf32> to vector<8x1xf32>
    %62 = tpu.concatenate %60, %61 in 1 : vector<8x255xf32>, vector<8x1xf32> -> vector<8x256xf32>
    %63 = vector.extract_strided_slice %0 {offsets = [5, 0], sizes = [1, 256], strides = [1, 1]} : vector<9x256xf32> to vector<1x256xf32>
    %64 = vector.broadcast %63 : vector<1x256xf32> to vector<8x256xf32>
    %65 = arith.mulf %62, %64 : vector<8x256xf32>
    %66 = vector.extract_strided_slice %2 {offsets = [5, 0, 0], sizes = [1, 8, 4], strides = [1, 1, 1]} : vector<9x8x4xf32> to vector<1x8x4xf32>
    %67 = vector.shape_cast %66 : vector<1x8x4xf32> to vector<8x4xf32>
    %68 = tpu.concatenate %67, %5 in 1 : vector<8x4xf32>, vector<8x4xf32> -> vector<8x8xf32>
    %69 = tpu.concatenate %5, %67 in 1 : vector<8x4xf32>, vector<8x4xf32> -> vector<8x8xf32>
    %70 = tpu.concatenate %68, %69 in 0 : vector<8x8xf32>, vector<8x8xf32> -> vector<16x8xf32>
    %71 = tpu.concatenate %49, %1, %65 in 0 : vector<8x256xf32>, vector<8x256xf32>, vector<8x256xf32> -> vector<24x256xf32>
    %72 = tpu.concatenate %54, %59, %70 in 1 : vector<16x8xf32>, vector<16x8xf32>, vector<16x8xf32> -> vector<16x24xf32>
    %cst_12 = arith.constant dense<0.000000e+00> : vector<16x256xf32>
    %73 = tpu.matmul %72, %71, %cst_12 {dimension_numbers = #tpu.dot_dimension_numbers<[1], [0], [0], [1], [0, 0, 1, 1], [], []>} : vector<16x24xf32>, vector<24x256xf32>, vector<16x256xf32> -> vector<16x256xf32>
    %74 = arith.addf %43, %73 : vector<16x256xf32>
    %75 = vector.extract_strided_slice %1 {offsets = [0, 15], sizes = [8, 241], strides = [1, 1]} : vector<8x256xf32> to vector<8x241xf32>
    %76 = vector.extract_strided_slice %1 {offsets = [0, 0], sizes = [8, 15], strides = [1, 1]} : vector<8x256xf32> to vector<8x15xf32>
    %77 = tpu.concatenate %75, %76 in 1 : vector<8x241xf32>, vector<8x15xf32> -> vector<8x256xf32>
    %78 = vector.extract_strided_slice %0 {offsets = [6, 0], sizes = [1, 256], strides = [1, 1]} : vector<9x256xf32> to vector<1x256xf32>
    %79 = vector.broadcast %78 : vector<1x256xf32> to vector<8x256xf32>
    %80 = arith.mulf %77, %79 : vector<8x256xf32>
    %81 = vector.extract_strided_slice %2 {offsets = [6, 0, 0], sizes = [1, 8, 4], strides = [1, 1, 1]} : vector<9x8x4xf32> to vector<1x8x4xf32>
    %82 = vector.shape_cast %81 : vector<1x8x4xf32> to vector<8x4xf32>
    %83 = tpu.concatenate %82, %5 in 1 : vector<8x4xf32>, vector<8x4xf32> -> vector<8x8xf32>
    %84 = tpu.concatenate %5, %82 in 1 : vector<8x4xf32>, vector<8x4xf32> -> vector<8x8xf32>
    %85 = tpu.concatenate %83, %84 in 0 : vector<8x8xf32>, vector<8x8xf32> -> vector<16x8xf32>
    %86 = vector.extract_strided_slice %1 {offsets = [0, 16], sizes = [8, 240], strides = [1, 1]} : vector<8x256xf32> to vector<8x240xf32>
    %87 = vector.extract_strided_slice %1 {offsets = [0, 0], sizes = [8, 16], strides = [1, 1]} : vector<8x256xf32> to vector<8x16xf32>
    %88 = tpu.concatenate %86, %87 in 1 : vector<8x240xf32>, vector<8x16xf32> -> vector<8x256xf32>
    %89 = vector.extract_strided_slice %0 {offsets = [7, 0], sizes = [1, 256], strides = [1, 1]} : vector<9x256xf32> to vector<1x256xf32>
    %90 = vector.broadcast %89 : vector<1x256xf32> to vector<8x256xf32>
    %91 = arith.mulf %88, %90 : vector<8x256xf32>
    %92 = vector.extract_strided_slice %2 {offsets = [7, 0, 0], sizes = [1, 8, 4], strides = [1, 1, 1]} : vector<9x8x4xf32> to vector<1x8x4xf32>
    %93 = vector.shape_cast %92 : vector<1x8x4xf32> to vector<8x4xf32>
    %94 = tpu.concatenate %93, %5 in 1 : vector<8x4xf32>, vector<8x4xf32> -> vector<8x8xf32>
    %95 = tpu.concatenate %5, %93 in 1 : vector<8x4xf32>, vector<8x4xf32> -> vector<8x8xf32>
    %96 = tpu.concatenate %94, %95 in 0 : vector<8x8xf32>, vector<8x8xf32> -> vector<16x8xf32>
    %97 = vector.extract_strided_slice %1 {offsets = [0, 17], sizes = [8, 239], strides = [1, 1]} : vector<8x256xf32> to vector<8x239xf32>
    %98 = vector.extract_strided_slice %1 {offsets = [0, 0], sizes = [8, 17], strides = [1, 1]} : vector<8x256xf32> to vector<8x17xf32>
    %99 = tpu.concatenate %97, %98 in 1 : vector<8x239xf32>, vector<8x17xf32> -> vector<8x256xf32>
    %100 = vector.extract_strided_slice %0 {offsets = [8, 0], sizes = [1, 256], strides = [1, 1]} : vector<9x256xf32> to vector<1x256xf32>
    %101 = vector.broadcast %100 : vector<1x256xf32> to vector<8x256xf32>
    %102 = arith.mulf %99, %101 : vector<8x256xf32>
    %103 = vector.extract_strided_slice %2 {offsets = [8, 0, 0], sizes = [1, 8, 4], strides = [1, 1, 1]} : vector<9x8x4xf32> to vector<1x8x4xf32>
    %104 = vector.shape_cast %103 : vector<1x8x4xf32> to vector<8x4xf32>
    %105 = tpu.concatenate %104, %5 in 1 : vector<8x4xf32>, vector<8x4xf32> -> vector<8x8xf32>
    %106 = tpu.concatenate %5, %104 in 1 : vector<8x4xf32>, vector<8x4xf32> -> vector<8x8xf32>
    %107 = tpu.concatenate %105, %106 in 0 : vector<8x8xf32>, vector<8x8xf32> -> vector<16x8xf32>
    %108 = tpu.concatenate %80, %91, %102 in 0 : vector<8x256xf32>, vector<8x256xf32>, vector<8x256xf32> -> vector<24x256xf32>
    %109 = tpu.concatenate %85, %96, %107 in 1 : vector<16x8xf32>, vector<16x8xf32>, vector<16x8xf32> -> vector<16x24xf32>
    %cst_13 = arith.constant dense<0.000000e+00> : vector<16x256xf32>
    %110 = tpu.matmul %109, %108, %cst_13 {dimension_numbers = #tpu.dot_dimension_numbers<[1], [0], [0], [1], [0, 0, 1, 1], [], []>} : vector<16x24xf32>, vector<24x256xf32>, vector<16x256xf32> -> vector<16x256xf32>
    %111 = arith.addf %74, %110 : vector<16x256xf32>
    %cst_14 = arith.constant dense<0.000000e+00> : vector<16xf32>
    %112 = vector.multi_reduction <add>, %111, %cst_14 [1] : vector<16x256xf32> to vector<16xf32>
    %113 = vector.shape_cast %112 : vector<16xf32> to vector<16x1xf32>
    %114 = arith.mulf %111, %111 : vector<16x256xf32>
    %cst_15 = arith.constant dense<0.000000e+00> : vector<16xf32>
    %115 = vector.multi_reduction <add>, %114, %cst_15 [1] : vector<16x256xf32> to vector<16xf32>
    %116 = vector.shape_cast %115 : vector<16xf32> to vector<16x1xf32>
    %117 = vector.extract_strided_slice %113 {offsets = [8, 0], sizes = [8, 1], strides = [1, 1]} : vector<16x1xf32> to vector<8x1xf32>
    %118 = vector.extract_strided_slice %113 {offsets = [0, 0], sizes = [8, 1], strides = [1, 1]} : vector<16x1xf32> to vector<8x1xf32>
    %119 = tpu.concatenate %117, %118 in 0 : vector<8x1xf32>, vector<8x1xf32> -> vector<16x1xf32>
    %120 = arith.addf %113, %119 : vector<16x1xf32>
    %121 = vector.extract_strided_slice %116 {offsets = [8, 0], sizes = [8, 1], strides = [1, 1]} : vector<16x1xf32> to vector<8x1xf32>
    %122 = vector.extract_strided_slice %116 {offsets = [0, 0], sizes = [8, 1], strides = [1, 1]} : vector<16x1xf32> to vector<8x1xf32>
    %123 = tpu.concatenate %121, %122 in 0 : vector<8x1xf32>, vector<8x1xf32> -> vector<16x1xf32>
    %124 = arith.addf %116, %123 : vector<16x1xf32>
    %cst_16 = arith.constant 0.001953125 : f32
    %125 = vector.broadcast %cst_16 : f32 to vector<16x1xf32>
    %126 = arith.mulf %120, %125 : vector<16x1xf32>
    %cst_17 = arith.constant 0.001953125 : f32
    %127 = vector.broadcast %cst_17 : f32 to vector<16x1xf32>
    %128 = arith.mulf %124, %127 : vector<16x1xf32>
    %129 = arith.mulf %126, %126 : vector<16x1xf32>
    %130 = arith.subf %128, %129 : vector<16x1xf32>
    %131 = tpu.concatenate %3, %3 in 0 : vector<8x1xf32>, vector<8x1xf32> -> vector<16x1xf32>
    %132 = tpu.concatenate %4, %4 in 0 : vector<8x1xf32>, vector<8x1xf32> -> vector<16x1xf32>
    %cst_18 = arith.constant 9.99999974E-6 : f32
    %133 = vector.broadcast %cst_18 : f32 to vector<16x1xf32>
    %134 = arith.addf %130, %133 : vector<16x1xf32>
    %135 = math.rsqrt %134 : vector<16x1xf32>
    %136 = arith.mulf %131, %135 : vector<16x1xf32>
    %137 = arith.mulf %126, %136 : vector<16x1xf32>
    %138 = arith.subf %132, %137 : vector<16x1xf32>
    %139 = vector.broadcast %136 : vector<16x1xf32> to vector<16x256xf32>
    %140 = arith.mulf %111, %139 : vector<16x256xf32>
    %141 = vector.broadcast %138 : vector<16x1xf32> to vector<16x256xf32>
    %142 = arith.addf %140, %141 : vector<16x256xf32>
    %cst_19 = arith.constant 0.000000e+00 : f32
    %143 = vector.broadcast %cst_19 : f32 to vector<16x256xf32>
    %144 = arith.maximumf %142, %143 : vector<16x256xf32>
    %c0_20 = arith.constant 0 : index
    %c0_21 = arith.constant 0 : index
    %c0_22 = arith.constant 0 : index
    %145 = vector.load %arg5[%c0_20, %c0_21, %c0_22] : memref<9x8x8xf32, #tpu.memory_space<vmem>>, vector<9x8x8xf32>
    %c0_23 = arith.constant 0 : index
    %c0_24 = arith.constant 0 : index
    %146 = vector.load %arg6[%c0_23, %c0_24] : memref<8x1xf32, #tpu.memory_space<vmem>>, vector<8x1xf32>
    %c0_25 = arith.constant 0 : index
    %c0_26 = arith.constant 0 : index
    %147 = vector.load %arg7[%c0_25, %c0_26] : memref<8x1xf32, #tpu.memory_space<vmem>>, vector<8x1xf32>
    %cst_27 = arith.constant 0.000000e+00 : f32
    %148 = vector.broadcast %cst_27 : f32 to vector<8x8xf32>
    %cst_28 = arith.constant 0.000000e+00 : f32
    %149 = vector.broadcast %cst_28 : f32 to vector<16x256xf32>
    %150 = vector.extract_strided_slice %144 {offsets = [0, 239], sizes = [16, 17], strides = [1, 1]} : vector<16x256xf32> to vector<16x17xf32>
    %151 = vector.extract_strided_slice %144 {offsets = [0, 0], sizes = [16, 239], strides = [1, 1]} : vector<16x256xf32> to vector<16x239xf32>
    %152 = tpu.concatenate %150, %151 in 1 : vector<16x17xf32>, vector<16x239xf32> -> vector<16x256xf32>
    %153 = vector.extract_strided_slice %0 {offsets = [0, 0], sizes = [1, 256], strides = [1, 1]} : vector<9x256xf32> to vector<1x256xf32>
    %154 = vector.broadcast %153 : vector<1x256xf32> to vector<16x256xf32>
    %155 = arith.mulf %152, %154 : vector<16x256xf32>
    %156 = vector.extract_strided_slice %145 {offsets = [0, 0, 0], sizes = [1, 8, 8], strides = [1, 1, 1]} : vector<9x8x8xf32> to vector<1x8x8xf32>
    %157 = vector.shape_cast %156 : vector<1x8x8xf32> to vector<8x8xf32>
    %158 = tpu.concatenate %157, %148 in 1 : vector<8x8xf32>, vector<8x8xf32> -> vector<8x16xf32>
    %159 = tpu.concatenate %148, %157 in 1 : vector<8x8xf32>, vector<8x8xf32> -> vector<8x16xf32>
    %160 = tpu.concatenate %158, %159 in 0 : vector<8x16xf32>, vector<8x16xf32> -> vector<16x16xf32>
    %161 = vector.extract_strided_slice %144 {offsets = [0, 240], sizes = [16, 16], strides = [1, 1]} : vector<16x256xf32> to vector<16x16xf32>
    %162 = vector.extract_strided_slice %144 {offsets = [0, 0], sizes = [16, 240], strides = [1, 1]} : vector<16x256xf32> to vector<16x240xf32>
    %163 = tpu.concatenate %161, %162 in 1 : vector<16x16xf32>, vector<16x240xf32> -> vector<16x256xf32>
    %164 = vector.extract_strided_slice %0 {offsets = [1, 0], sizes = [1, 256], strides = [1, 1]} : vector<9x256xf32> to vector<1x256xf32>
    %165 = vector.broadcast %164 : vector<1x256xf32> to vector<16x256xf32>
    %166 = arith.mulf %163, %165 : vector<16x256xf32>
    %167 = vector.extract_strided_slice %145 {offsets = [1, 0, 0], sizes = [1, 8, 8], strides = [1, 1, 1]} : vector<9x8x8xf32> to vector<1x8x8xf32>
    %168 = vector.shape_cast %167 : vector<1x8x8xf32> to vector<8x8xf32>
    %169 = tpu.concatenate %168, %148 in 1 : vector<8x8xf32>, vector<8x8xf32> -> vector<8x16xf32>
    %170 = tpu.concatenate %148, %168 in 1 : vector<8x8xf32>, vector<8x8xf32> -> vector<8x16xf32>
    %171 = tpu.concatenate %169, %170 in 0 : vector<8x16xf32>, vector<8x16xf32> -> vector<16x16xf32>
    %172 = vector.extract_strided_slice %144 {offsets = [0, 241], sizes = [16, 15], strides = [1, 1]} : vector<16x256xf32> to vector<16x15xf32>
    %173 = vector.extract_strided_slice %144 {offsets = [0, 0], sizes = [16, 241], strides = [1, 1]} : vector<16x256xf32> to vector<16x241xf32>
    %174 = tpu.concatenate %172, %173 in 1 : vector<16x15xf32>, vector<16x241xf32> -> vector<16x256xf32>
    %175 = vector.extract_strided_slice %0 {offsets = [2, 0], sizes = [1, 256], strides = [1, 1]} : vector<9x256xf32> to vector<1x256xf32>
    %176 = vector.broadcast %175 : vector<1x256xf32> to vector<16x256xf32>
    %177 = arith.mulf %174, %176 : vector<16x256xf32>
    %178 = vector.extract_strided_slice %145 {offsets = [2, 0, 0], sizes = [1, 8, 8], strides = [1, 1, 1]} : vector<9x8x8xf32> to vector<1x8x8xf32>
    %179 = vector.shape_cast %178 : vector<1x8x8xf32> to vector<8x8xf32>
    %180 = tpu.concatenate %179, %148 in 1 : vector<8x8xf32>, vector<8x8xf32> -> vector<8x16xf32>
    %181 = tpu.concatenate %148, %179 in 1 : vector<8x8xf32>, vector<8x8xf32> -> vector<8x16xf32>
    %182 = tpu.concatenate %180, %181 in 0 : vector<8x16xf32>, vector<8x16xf32> -> vector<16x16xf32>
    %183 = tpu.concatenate %155, %166, %177 in 0 : vector<16x256xf32>, vector<16x256xf32>, vector<16x256xf32> -> vector<48x256xf32>
    %184 = tpu.concatenate %160, %171, %182 in 1 : vector<16x16xf32>, vector<16x16xf32>, vector<16x16xf32> -> vector<16x48xf32>
    %cst_29 = arith.constant dense<0.000000e+00> : vector<16x256xf32>
    %185 = tpu.matmul %184, %183, %cst_29 {dimension_numbers = #tpu.dot_dimension_numbers<[1], [0], [0], [1], [0, 0, 1, 1], [], []>} : vector<16x48xf32>, vector<48x256xf32>, vector<16x256xf32> -> vector<16x256xf32>
    %186 = arith.addf %149, %185 : vector<16x256xf32>
    %187 = vector.extract_strided_slice %144 {offsets = [0, 255], sizes = [16, 1], strides = [1, 1]} : vector<16x256xf32> to vector<16x1xf32>
    %188 = vector.extract_strided_slice %144 {offsets = [0, 0], sizes = [16, 255], strides = [1, 1]} : vector<16x256xf32> to vector<16x255xf32>
    %189 = tpu.concatenate %187, %188 in 1 : vector<16x1xf32>, vector<16x255xf32> -> vector<16x256xf32>
    %190 = vector.extract_strided_slice %0 {offsets = [3, 0], sizes = [1, 256], strides = [1, 1]} : vector<9x256xf32> to vector<1x256xf32>
    %191 = vector.broadcast %190 : vector<1x256xf32> to vector<16x256xf32>
    %192 = arith.mulf %189, %191 : vector<16x256xf32>
    %193 = vector.extract_strided_slice %145 {offsets = [3, 0, 0], sizes = [1, 8, 8], strides = [1, 1, 1]} : vector<9x8x8xf32> to vector<1x8x8xf32>
    %194 = vector.shape_cast %193 : vector<1x8x8xf32> to vector<8x8xf32>
    %195 = tpu.concatenate %194, %148 in 1 : vector<8x8xf32>, vector<8x8xf32> -> vector<8x16xf32>
    %196 = tpu.concatenate %148, %194 in 1 : vector<8x8xf32>, vector<8x8xf32> -> vector<8x16xf32>
    %197 = tpu.concatenate %195, %196 in 0 : vector<8x16xf32>, vector<8x16xf32> -> vector<16x16xf32>
    %198 = vector.extract_strided_slice %145 {offsets = [4, 0, 0], sizes = [1, 8, 8], strides = [1, 1, 1]} : vector<9x8x8xf32> to vector<1x8x8xf32>
    %199 = vector.shape_cast %198 : vector<1x8x8xf32> to vector<8x8xf32>
    %200 = tpu.concatenate %199, %148 in 1 : vector<8x8xf32>, vector<8x8xf32> -> vector<8x16xf32>
    %201 = tpu.concatenate %148, %199 in 1 : vector<8x8xf32>, vector<8x8xf32> -> vector<8x16xf32>
    %202 = tpu.concatenate %200, %201 in 0 : vector<8x16xf32>, vector<8x16xf32> -> vector<16x16xf32>
    %203 = vector.extract_strided_slice %144 {offsets = [0, 1], sizes = [16, 255], strides = [1, 1]} : vector<16x256xf32> to vector<16x255xf32>
    %204 = vector.extract_strided_slice %144 {offsets = [0, 0], sizes = [16, 1], strides = [1, 1]} : vector<16x256xf32> to vector<16x1xf32>
    %205 = tpu.concatenate %203, %204 in 1 : vector<16x255xf32>, vector<16x1xf32> -> vector<16x256xf32>
    %206 = vector.extract_strided_slice %0 {offsets = [5, 0], sizes = [1, 256], strides = [1, 1]} : vector<9x256xf32> to vector<1x256xf32>
    %207 = vector.broadcast %206 : vector<1x256xf32> to vector<16x256xf32>
    %208 = arith.mulf %205, %207 : vector<16x256xf32>
    %209 = vector.extract_strided_slice %145 {offsets = [5, 0, 0], sizes = [1, 8, 8], strides = [1, 1, 1]} : vector<9x8x8xf32> to vector<1x8x8xf32>
    %210 = vector.shape_cast %209 : vector<1x8x8xf32> to vector<8x8xf32>
    %211 = tpu.concatenate %210, %148 in 1 : vector<8x8xf32>, vector<8x8xf32> -> vector<8x16xf32>
    %212 = tpu.concatenate %148, %210 in 1 : vector<8x8xf32>, vector<8x8xf32> -> vector<8x16xf32>
    %213 = tpu.concatenate %211, %212 in 0 : vector<8x16xf32>, vector<8x16xf32> -> vector<16x16xf32>
    %214 = tpu.concatenate %192, %144, %208 in 0 : vector<16x256xf32>, vector<16x256xf32>, vector<16x256xf32> -> vector<48x256xf32>
    %215 = tpu.concatenate %197, %202, %213 in 1 : vector<16x16xf32>, vector<16x16xf32>, vector<16x16xf32> -> vector<16x48xf32>
    %cst_30 = arith.constant dense<0.000000e+00> : vector<16x256xf32>
    %216 = tpu.matmul %215, %214, %cst_30 {dimension_numbers = #tpu.dot_dimension_numbers<[1], [0], [0], [1], [0, 0, 1, 1], [], []>} : vector<16x48xf32>, vector<48x256xf32>, vector<16x256xf32> -> vector<16x256xf32>
    %217 = arith.addf %186, %216 : vector<16x256xf32>
    %218 = vector.extract_strided_slice %144 {offsets = [0, 15], sizes = [16, 241], strides = [1, 1]} : vector<16x256xf32> to vector<16x241xf32>
    %219 = vector.extract_strided_slice %144 {offsets = [0, 0], sizes = [16, 15], strides = [1, 1]} : vector<16x256xf32> to vector<16x15xf32>
    %220 = tpu.concatenate %218, %219 in 1 : vector<16x241xf32>, vector<16x15xf32> -> vector<16x256xf32>
    %221 = vector.extract_strided_slice %0 {offsets = [6, 0], sizes = [1, 256], strides = [1, 1]} : vector<9x256xf32> to vector<1x256xf32>
    %222 = vector.broadcast %221 : vector<1x256xf32> to vector<16x256xf32>
    %223 = arith.mulf %220, %222 : vector<16x256xf32>
    %224 = vector.extract_strided_slice %145 {offsets = [6, 0, 0], sizes = [1, 8, 8], strides = [1, 1, 1]} : vector<9x8x8xf32> to vector<1x8x8xf32>
    %225 = vector.shape_cast %224 : vector<1x8x8xf32> to vector<8x8xf32>
    %226 = tpu.concatenate %225, %148 in 1 : vector<8x8xf32>, vector<8x8xf32> -> vector<8x16xf32>
    %227 = tpu.concatenate %148, %225 in 1 : vector<8x8xf32>, vector<8x8xf32> -> vector<8x16xf32>
    %228 = tpu.concatenate %226, %227 in 0 : vector<8x16xf32>, vector<8x16xf32> -> vector<16x16xf32>
    %229 = vector.extract_strided_slice %144 {offsets = [0, 16], sizes = [16, 240], strides = [1, 1]} : vector<16x256xf32> to vector<16x240xf32>
    %230 = vector.extract_strided_slice %144 {offsets = [0, 0], sizes = [16, 16], strides = [1, 1]} : vector<16x256xf32> to vector<16x16xf32>
    %231 = tpu.concatenate %229, %230 in 1 : vector<16x240xf32>, vector<16x16xf32> -> vector<16x256xf32>
    %232 = vector.extract_strided_slice %0 {offsets = [7, 0], sizes = [1, 256], strides = [1, 1]} : vector<9x256xf32> to vector<1x256xf32>
    %233 = vector.broadcast %232 : vector<1x256xf32> to vector<16x256xf32>
    %234 = arith.mulf %231, %233 : vector<16x256xf32>
    %235 = vector.extract_strided_slice %145 {offsets = [7, 0, 0], sizes = [1, 8, 8], strides = [1, 1, 1]} : vector<9x8x8xf32> to vector<1x8x8xf32>
    %236 = vector.shape_cast %235 : vector<1x8x8xf32> to vector<8x8xf32>
    %237 = tpu.concatenate %236, %148 in 1 : vector<8x8xf32>, vector<8x8xf32> -> vector<8x16xf32>
    %238 = tpu.concatenate %148, %236 in 1 : vector<8x8xf32>, vector<8x8xf32> -> vector<8x16xf32>
    %239 = tpu.concatenate %237, %238 in 0 : vector<8x16xf32>, vector<8x16xf32> -> vector<16x16xf32>
    %240 = vector.extract_strided_slice %144 {offsets = [0, 17], sizes = [16, 239], strides = [1, 1]} : vector<16x256xf32> to vector<16x239xf32>
    %241 = vector.extract_strided_slice %144 {offsets = [0, 0], sizes = [16, 17], strides = [1, 1]} : vector<16x256xf32> to vector<16x17xf32>
    %242 = tpu.concatenate %240, %241 in 1 : vector<16x239xf32>, vector<16x17xf32> -> vector<16x256xf32>
    %243 = vector.extract_strided_slice %0 {offsets = [8, 0], sizes = [1, 256], strides = [1, 1]} : vector<9x256xf32> to vector<1x256xf32>
    %244 = vector.broadcast %243 : vector<1x256xf32> to vector<16x256xf32>
    %245 = arith.mulf %242, %244 : vector<16x256xf32>
    %246 = vector.extract_strided_slice %145 {offsets = [8, 0, 0], sizes = [1, 8, 8], strides = [1, 1, 1]} : vector<9x8x8xf32> to vector<1x8x8xf32>
    %247 = vector.shape_cast %246 : vector<1x8x8xf32> to vector<8x8xf32>
    %248 = tpu.concatenate %247, %148 in 1 : vector<8x8xf32>, vector<8x8xf32> -> vector<8x16xf32>
    %249 = tpu.concatenate %148, %247 in 1 : vector<8x8xf32>, vector<8x8xf32> -> vector<8x16xf32>
    %250 = tpu.concatenate %248, %249 in 0 : vector<8x16xf32>, vector<8x16xf32> -> vector<16x16xf32>
    %251 = tpu.concatenate %223, %234, %245 in 0 : vector<16x256xf32>, vector<16x256xf32>, vector<16x256xf32> -> vector<48x256xf32>
    %252 = tpu.concatenate %228, %239, %250 in 1 : vector<16x16xf32>, vector<16x16xf32>, vector<16x16xf32> -> vector<16x48xf32>
    %cst_31 = arith.constant dense<0.000000e+00> : vector<16x256xf32>
    %253 = tpu.matmul %252, %251, %cst_31 {dimension_numbers = #tpu.dot_dimension_numbers<[1], [0], [0], [1], [0, 0, 1, 1], [], []>} : vector<16x48xf32>, vector<48x256xf32>, vector<16x256xf32> -> vector<16x256xf32>
    %254 = arith.addf %217, %253 : vector<16x256xf32>
    %cst_32 = arith.constant dense<0.000000e+00> : vector<16xf32>
    %255 = vector.multi_reduction <add>, %254, %cst_32 [1] : vector<16x256xf32> to vector<16xf32>
    %256 = vector.shape_cast %255 : vector<16xf32> to vector<16x1xf32>
    %257 = arith.mulf %254, %254 : vector<16x256xf32>
    %cst_33 = arith.constant dense<0.000000e+00> : vector<16xf32>
    %258 = vector.multi_reduction <add>, %257, %cst_33 [1] : vector<16x256xf32> to vector<16xf32>
    %259 = vector.shape_cast %258 : vector<16xf32> to vector<16x1xf32>
    %260 = vector.extract_strided_slice %256 {offsets = [8, 0], sizes = [8, 1], strides = [1, 1]} : vector<16x1xf32> to vector<8x1xf32>
    %261 = vector.extract_strided_slice %256 {offsets = [0, 0], sizes = [8, 1], strides = [1, 1]} : vector<16x1xf32> to vector<8x1xf32>
    %262 = tpu.concatenate %260, %261 in 0 : vector<8x1xf32>, vector<8x1xf32> -> vector<16x1xf32>
    %263 = arith.addf %256, %262 : vector<16x1xf32>
    %264 = vector.extract_strided_slice %259 {offsets = [8, 0], sizes = [8, 1], strides = [1, 1]} : vector<16x1xf32> to vector<8x1xf32>
    %265 = vector.extract_strided_slice %259 {offsets = [0, 0], sizes = [8, 1], strides = [1, 1]} : vector<16x1xf32> to vector<8x1xf32>
    %266 = tpu.concatenate %264, %265 in 0 : vector<8x1xf32>, vector<8x1xf32> -> vector<16x1xf32>
    %267 = arith.addf %259, %266 : vector<16x1xf32>
    %cst_34 = arith.constant 0.001953125 : f32
    %268 = vector.broadcast %cst_34 : f32 to vector<16x1xf32>
    %269 = arith.mulf %263, %268 : vector<16x1xf32>
    %cst_35 = arith.constant 0.001953125 : f32
    %270 = vector.broadcast %cst_35 : f32 to vector<16x1xf32>
    %271 = arith.mulf %267, %270 : vector<16x1xf32>
    %272 = arith.mulf %269, %269 : vector<16x1xf32>
    %273 = arith.subf %271, %272 : vector<16x1xf32>
    %274 = tpu.concatenate %146, %146 in 0 : vector<8x1xf32>, vector<8x1xf32> -> vector<16x1xf32>
    %275 = tpu.concatenate %147, %147 in 0 : vector<8x1xf32>, vector<8x1xf32> -> vector<16x1xf32>
    %cst_36 = arith.constant 9.99999974E-6 : f32
    %276 = vector.broadcast %cst_36 : f32 to vector<16x1xf32>
    %277 = arith.addf %273, %276 : vector<16x1xf32>
    %278 = math.rsqrt %277 : vector<16x1xf32>
    %279 = arith.mulf %274, %278 : vector<16x1xf32>
    %280 = arith.mulf %269, %279 : vector<16x1xf32>
    %281 = arith.subf %275, %280 : vector<16x1xf32>
    %282 = vector.broadcast %279 : vector<16x1xf32> to vector<16x256xf32>
    %283 = arith.mulf %254, %282 : vector<16x256xf32>
    %284 = vector.broadcast %281 : vector<16x1xf32> to vector<16x256xf32>
    %285 = arith.addf %283, %284 : vector<16x256xf32>
    %cst_37 = arith.constant 0.000000e+00 : f32
    %286 = vector.broadcast %cst_37 : f32 to vector<16x256xf32>
    %287 = arith.maximumf %285, %286 : vector<16x256xf32>
    %c0_38 = arith.constant 0 : index
    %c0_39 = arith.constant 0 : index
    %288 = vector.load %arg8[%c0_38, %c0_39] : memref<16x256xf32, #tpu.memory_space<vmem>>, vector<16x256xf32>
    tpu.vector_store %arg8[%c0_38, %c0_39], %287 {strides = array<i32>} : memref<16x256xf32, #tpu.memory_space<vmem>>, vector<16x256xf32>,
    return
  }
}

</mosaic_0001>

<bundles_post_ra>
// kernel: double_conv.1
= control target key start
LH: loop header
LB: loop body
LE: loop exit
PB: predicated region body
PF: predicated region fallthrough
CT: control target
= control target key end

     0   :  { %s1347_s9 = smov 4   ;;  %s1348_s22 = smov 1   ;;  %v1350_v8 = vmov 0.0   ;;  %v58_v9 = vlaneseq  ;;  %vm68_vm0 = vcmask 31744   ;;  %vm153_vm1 = vcmask 7168   ;;  %s1986_s2 = inlined_call_operand.vmem [shape: f32[9,8,4], index: 2, kind: input, shape index: {}]   ;;  %s1987_s1 = inlined_call_operand.vmem [shape: f32[8,256], index: 1, kind: input, shape index: {}]   ;;  %s1988_s0 = inlined_call_operand.vmem [shape: f32[9,256], index: 0, kind: input, shape index: {}]   ;;  %s1989_s5 = inlined_call_operand.vmem [shape: f32[9,8,8], index: 5, kind: input, shape index: {}]   ;;  %s1990_s3 = inlined_call_operand.vmem [shape: f32[8,1], index: 3, kind: input, shape index: {}]   ;;  %s1991_s4 = inlined_call_operand.vmem [shape: f32[8,1], index: 4, kind: input, shape index: {}]   ;;  %s1992_s6 = inlined_call_operand.vmem [shape: f32[8,1], index: 6, kind: input, shape index: {}]   ;;  %s1993_s7 = inlined_call_operand.vmem [shape: f32[8,1], index: 7, kind: input, shape index: {}]   ;;  %s1994_s8 = inlined_call_operand.vmem [shape: f32[16,256], index: 8, kind: output, shape index: {}]  }
   0x1   :  { %v39_v0 = vld [vmem:[%s1986_s2 + $0x20] sm:$0xff]  ;;  %v36_v1 = vld [vmem:[%s1986_s2 + $0x8] sm:$0xff]  ;;  %v37_v3 = vld [vmem:[%s1986_s2 + $0x10] sm:$0xff]  ;;  %s1349_s23 = smov 127   ;;  %297 = vmatprep.mubr.f32.mxu0 %v1350_v8  ;;  %900 = vmatprep.mubr.f32.mxu1 %v1350_v8  ;;  %s1352_s24 = smov 16   ;;  %vm184_vm2 = vcmask 1039360  }
   0x2   :  { %176 = vrot.lane.b32.xlu0 %v39_v0, %s1347_s9  ;;  %97 = vrot.lane.b32.xlu1 %v36_v1, %s1347_s9  ;;  %v40_v2 = vld [vmem:[%s1986_s2 + $0x28] sm:$0xff]  ;;  %v1424_v4 = vld [vmem:[%s1986_s2 + $0x38] sm:$0xff]  ;;  %v1463_v10 = vshrl.u32 %v58_v9, 7  ;;  %v174_v11 = vsel %vm68_vm0, %v39_v0, 0.0  ;;  %s1353_s27 = smov 8   ;;  %s1354_s30 = smov 15  }
   0x3   :  { %v1429_v5 = vld [vmem:[%s1986_s2 + $0x40] sm:$0xff]  ;;  %v1438_v6 = vld [vmem:[%s1987_s1 + $0x8] sm:$0xff]  ;;  %v200_v12 = vsel %vm68_vm0, %v40_v2, 0.0  ;;  %v1483_v16 = vld [vmem:[%s1986_s2 + $0x18] sm:$0xff]  ;;  %s1355_s10 = smov 113   ;;  %s1356_s11 = smov 112  }
   0x4   :  { %v1443_v7 = vld [vmem:[%s1987_s1] sm:$0xff]  ;;  %s1351_s1 = smov 17   ;;  %v405_v13 = vsub.s32 6, %v1463_v10  ;;  %v431_v17 = vsub.s32 7, %v1463_v10  ;;  %v95_v19 = vsel %vm68_vm0, %v36_v1, 0.0  ;;  %v121_v20 = vsel %vm68_vm0, %v37_v3, 0.0 }
   0x5   :  { %v1471_v14 = vld [vmem:[%s1988_s0] sm:$0xff]  ;;  %s1357_s14 = smov 111   ;;  %v160_v28 = vsub.s32 3, %v1463_v10  ;;  %v1530_v31 = vld [vmem:[%s1988_s0 + $0x8] sm:$0xff]  ;;  %v192_v34 = vsub.s32 5, %v1463_v10  ;;  %v439_v37 = vsel %vm68_vm0, %v1424_v4, 0.0 }
   0x6   :  { %202 = vrot.lane.b32.xlu0 %v40_v2, %s1347_s9  ;;  %123 = vrot.lane.b32.xlu1 %v37_v3, %s1347_s9  ;;  %v1478_v15 = vrot.slane %v1471_v14, %v405_v13  ;;  %v1493_v18 = vrot.slane %v1471_v14, %v431_v17  ;;  %v1511_v21 = vld [vmem:[%s1986_s2] sm:$0xff]  ;;  %v465_v38 = vsel %vm68_vm0, %v1429_v5, 0.0  ;;  %v1558_v47 = vld [vmem:[%s1986_s2 + $0x30] sm:$0xff]  ;;  %v60_v51 = vsub.s32 0, %v1463_v10  ;;  %s1359_s15 = smov 32  }
   0x7   :  { %v1536_v35 = vrot.slane %v1530_v31, %v160_v28  ;;  %v1539_v36 = vrot.slane %v1471_v14, %v160_v28  ;;  %v1550_v43 = vrot.slane %v1530_v31, %v192_v34  ;;  %v1561_v50 = vrot.slane %v1471_v14, %v192_v34 }
   0x8   :  { %vm53_vm3 = vcmask 138240   ;;  %v87_v57 = vsub.s32 1, %v1463_v10  ;;  %v1576_v62 = vrot.slane %v1471_v14, %v60_v51  ;;  %v1579_v63 = vrot.slane %v1530_v31, %v60_v51 }
   0x9   :  { %vm80_vm4 = vcmask 130048   ;;  %vm143_vm5 = vcmask 64512   ;;  %vm226_vm6 = vcmask 195584   ;;  %v113_v28 = vsub.s32 2, %v1463_v10 }
   0xa   :  { %441 = vrot.lane.b32.xlu0 %v1424_v4, %s1347_s9  ;;  %467 = vrot.lane.b32.xlu1 %v1429_v5, %s1347_s9  ;;  %v1585_v2 = vrot.slane %v1471_v14, %v87_v57  ;;  %v1588_v3 = vrot.slane %v1530_v31, %v87_v57  ;;  %vm106_vm7 = vcmask 121856   ;;  %vm397_vm8 = vcmask 924672  }
   0xb   :  { %vm423_vm9 = vcmask 916480   ;;  %vm449_vm10 = vcmask 908288   ;;  %vm829_vm11 = vcmask 392192   ;;  %vm744_vm12 = vcmask 261120  }
   0xe   :  { %148 = vrot.lane.b32.xlu0 %v1438_v6, %s1348_s22  ;;  %151 = vrot.lane.b32.xlu1 %v1443_v7, %s1348_s22 }
  0x12   :  { %180 = vrot.lane.b32.xlu0 %v1443_v7, %s1349_s23  ;;  %182 = vrot.lane.b32.xlu1 %v1438_v6, %s1349_s23 }
  0x16   :  { %47 = vrot.lane.b32.xlu0 %v1438_v6, %s1351_s1  ;;  %51 = vrot.lane.b32.xlu1 %v1443_v7, %s1351_s1 }
  0x1a   :  { %75 = vrot.lane.b32.xlu0 %v1438_v6, %s1352_s24  ;;  %78 = vrot.lane.b32.xlu1 %v1443_v7, %s1352_s24 }
  0x1e   :  { %208 = vrot.lane.b32.xlu0 %v174_v11, %s1353_s27  ;;  %216 = vrot.lane.b32.xlu1 %v200_v12, %s1352_s24  ;;  %v168_v12 = vsel %vm68_vm0, %v1483_v16, 0.0 }
  0x22   :  { %170 = vrot.lane.b32.xlu0 %v1483_v16, %s1347_s9  ;;  %104 = vrot.lane.b32.xlu1 %v1443_v7, %s1354_s30 }
  0x26   :  { %101 = vrot.lane.b32.xlu0 %v1438_v6, %s1354_s30  ;;  %393 = vrot.lane.b32.xlu1 %v1443_v7, %s1355_s10 }
  0x2a   :  { %395 = vrot.lane.b32.xlu0 %v1438_v6, %s1355_s10  ;;  %419 = vrot.lane.b32.xlu1 %v1443_v7, %s1356_s11 }
  0x2e   :  { %421 = vrot.lane.b32.xlu0 %v1438_v6, %s1356_s11  ;;  %129 = vrot.lane.b32.xlu1 %v95_v19, %s1353_s27 }
  0x32   :  { %137 = vrot.lane.b32.xlu0 %v121_v20, %s1352_s24  ;;  %71 = vrot.lane.b32.xlu1 %v1511_v21, %s1347_s9 }
  0x36   :  { %445 = vrot.lane.b32.xlu0 %v1443_v7, %s1357_s14 }
  0x74   :  { %v177_v22 = vpop.permute.xlu0 %176  ;;  %v98_v23 = vpop.permute.xlu1 %97 }
  0x75   :  { %v179_v24 = vsel %vm68_vm0, 0.0, %v177_v22  ;;  %v100_v29 = vsel %vm68_vm0, 0.0, %v98_v23 }
  0x76   :  { %210 = vrot.lane.b32.xlu1 %v179_v24, %s1353_s27 }
  0x78   :  { %v203_v25 = vpop.permute.xlu0 %202  ;;  %v124_v26 = vpop.permute.xlu1 %123 }
  0x79   :  { %v205_v27 = vsel %vm68_vm0, 0.0, %v203_v25  ;;  %v126_v30 = vsel %vm68_vm0, 0.0, %v124_v26 }
  0x7a   :  { %218 = vrot.lane.b32.xlu0 %v205_v27, %s1352_s24  ;;  %447 = vrot.lane.b32.xlu1 %v1438_v6, %s1357_s14 }
  0x7c   :  { %v442_v32 = vpop.permute.xlu0 %441  ;;  %v468_v33 = vpop.permute.xlu1 %467 }
  0x7d   :  { %v444_v46 = vsel %vm68_vm0, 0.0, %v442_v32  ;;  %v470_v58 = vsel %vm68_vm0, 0.0, %v468_v33  ;;  %v1607_v32 = vrot.slane %v1530_v31, %v113_v28 }
  0x7e   :  { %131 = vrot.lane.b32.xlu0 %v100_v29, %s1353_s27  ;;  %139 = vrot.lane.b32.xlu1 %v126_v30, %s1352_s24  ;;  %v1604_v30 = vrot.slane %v1471_v14, %v113_v28  ;;  %v1616_v14 = vrot.slane %v1530_v31, %v405_v13 }
  0x80   :  { %v149_v39 = vpop.permute.xlu0 %148  ;;  %v152_v40 = vpop.permute.xlu1 %151 }
  0x81   :  { %v157_v41 = vsel %vm153_vm1, %v149_v39, %v152_v40  ;;  %v154_v42 = vsel %vm153_vm1, %v152_v40, %v149_v39 }
  0x82   :  { %473 = vrot.lane.b32.xlu0 %v439_v37, %s1353_s27  ;;  %481 = vrot.lane.b32.xlu1 %v465_v38, %s1352_s24  ;;  %v167_v44 = vmul.f32 %v1536_v35, %v154_v42  ;;  %v166_v45 = vmul.f32 %v1539_v36, %v157_v41 }
  0x84   :  { %v181_v48 = vpop.permute.xlu0 %180  ;;  %v183_v49 = vpop.permute.xlu1 %182  ;;  %v1258_v52 = vpack.c.bf16 %v1438_v6, %v167_v44  ;;  %v1260_v53 = vpack.c.bf16 %v1443_v7, %v166_v45 }
  0x85   :  { %v185_v54 = vsel %vm184_vm2, %v181_v48, %v183_v49  ;;  %v189_v55 = vsel %vm184_vm2, %v183_v49, %v181_v48 }
  0x86   :  { %415 = vrot.lane.b32.xlu0 %v1558_v47, %s1347_s9  ;;  %475 = vrot.lane.b32.xlu1 %v444_v46, %s1353_s27  ;;  %v199_v56 = vmul.f32 %v1550_v43, %v189_v55  ;;  %v198_v59 = vmul.f32 %v1561_v50, %v185_v54  ;;  %v1623_v46 = vrot.slane %v1530_v31, %v431_v17 }
  0x87   :  { %1259 = vmatprep.subr.bf16.mxu0 %v1258_v52 }
  0x88   :  { %v48_v60 = vpop.permute.xlu0 %47  ;;  %v52_v61 = vpop.permute.xlu1 %51  ;;  %1261 = vmatpush1.bf16.msra.mxu0 %v1260_v53 }
  0x89   :  { %v54_v0 = vsel %vm53_vm3, %v52_v61, %v48_v60  ;;  %v57_v1 = vsel %vm53_vm3, %v48_v60, %v52_v61  ;;  %237 = vmatprep.subr.mxu0 %v199_v56 }
  0x8a   :  { %483 = vrot.lane.b32.xlu0 %v470_v58, %s1352_s24  ;;  %v66_v4 = vmul.f32 %v1576_v62, %v57_v1  ;;  %v67_v5 = vmul.f32 %v1579_v63, %v54_v0 }
  0x8c   :  { %v76_v6 = vpop.permute.xlu0 %75  ;;  %v79_v7 = vpop.permute.xlu1 %78  ;;  %238 = vmatpush1.msra.mxu0 %v198_v59  ;;  %v69_v59 = vsel %vm68_vm0, %v1511_v21, 0.0 }
  0x8d   :  { %v81_v9 = vsel %vm80_vm4, %v79_v7, %v76_v6  ;;  %v84_v11 = vsel %vm80_vm4, %v76_v6, %v79_v7  ;;  %v1641_v6 = vld [vmem:[%s1988_s0 + $0x18] ss:$0 sm:$0xff] }
  0x8e   :  { %v93_v19 = vmul.f32 %v1585_v2, %v84_v11  ;;  %v94_v20 = vmul.f32 %v1588_v3, %v81_v9 }
  0x90   :  { %v1264_v22 = vpack.c.bf16 %v93_v19, %v66_v4  ;;  %v209_v23 = vpop.permute.xlu0 %208  ;;  %v217_v24 = vpop.permute.xlu1 %216  ;;  %v1262_v25 = vpack.c.bf16 %v94_v20, %v67_v5  ;;  %v1650_v19 = vld [vmem:[%s1988_s0 + $0x10] ss:$0 sm:$0xff] }
  0x91   :  { %v222_v26 = vsel %vm143_vm5, %v168_v12, %v209_v23 }
  0x92   :  { %v224_v27 = vsel %vm80_vm4, %v222_v26, %v217_v24  ;;  %1263 = vmatprep.subr.bf16.mxu0 %v1262_v25  ;;  %v413_v24 = vsel %vm68_vm0, %v1558_v47, 0.0 }
  0x93   :  { %1244 = vmatmul.mubr.msk.f32.vlgmr.msra.gmra.mrb[0].mxu0 %vm226_vm6, %v224_v27 }
  0x94   :  { %1265 = vmatpush1.bf16.msra.mxu0 %v1264_v22  ;;  %v171_v16 = vpop.permute.xlu0 %170  ;;  %v105_v29 = vpop.permute.xlu1 %104  ;;  %303 = vmatprep.mubr.f32.mxu0 %v1350_v8 }
  0x95   :  { %v173_v60 = vsel %vm68_vm0, 0.0, %v171_v16 }
  0x98   :  { %v102_v33 = vpop.permute.xlu0 %101  ;;  %v394_v34 = vpop.permute.xlu1 %393 }
  0x99   :  { %v107_v37 = vsel %vm106_vm7, %v105_v29, %v102_v33  ;;  %v110_v38 = vsel %vm106_vm7, %v102_v33, %v105_v29 }
  0x9a   :  { %v119_v39 = vmul.f32 %v1604_v30, %v110_v38  ;;  %v120_v40 = vmul.f32 %v1607_v32, %v107_v37 }
  0x9c   :  { %v396_v41 = vpop.permute.xlu0 %395  ;;  %320 = vmatprep.subr.mxu0 %v120_v40  ;;  %v420_v45 = vpop.permute.xlu1 %419 }
  0x9d   :  { %v398_v42 = vsel %vm397_vm8, %v394_v34, %v396_v41  ;;  %v402_v44 = vsel %vm397_vm8, %v396_v41, %v394_v34  ;;  %321 = vmatpush1.msra.mxu0 %v119_v39 }
  0x9e   :  { %v411_v48 = vmul.f32 %v1478_v15, %v398_v42  ;;  %v412_v49 = vmul.f32 %v1616_v14, %v402_v44 }
  0xa0   :  { %v422_v51 = vpop.permute.xlu0 %421  ;;  %v130_v10 = vpop.permute.xlu1 %129 }
  0xa1   :  { %v424_v13 = vsel %vm423_vm9, %v420_v45, %v422_v51  ;;  %v428_v52 = vsel %vm423_vm9, %v422_v51, %v420_v45  ;;  %v144_v5 = vsel %vm143_vm5, %v69_v59, %v130_v10  ;;  %v632_v10 = vld [vmem:[%s1989_s5 + $0x28] sm:$0xff] }
  0xa2   :  { %v437_v53 = vmul.f32 %v1493_v18, %v424_v13  ;;  %v438_v54 = vmul.f32 %v1623_v46, %v428_v52 }
  0xa4   :  { %v1268_v55 = vpack.c.bf16 %v437_v53, %v411_v48  ;;  %v1266_v56 = vpack.c.bf16 %v438_v54, %v412_v49  ;;  %v138_v57 = vpop.permute.xlu0 %137  ;;  %v72_v17 = vpop.permute.xlu1 %71 }
  0xa5   :  { %v146_v11 = vsel %vm80_vm4, %v144_v5, %v138_v57  ;;  %v74_v12 = vsel %vm68_vm0, 0.0, %v72_v17 }
  0xa6   :  { %1267 = vmatprep.subr.bf16.mxu0 %v1266_v56  ;;  %v1358_v56 = vmov 0  }
  0xa7   :  { %1341 = vset.pattern.permute.xlu0 %v1358_v56  ;;  %1342 = vset.pattern.permute.xlu1 %v1358_v56 }
  0xa8   :  { %v446_v31 = vpop.permute.xlu0 %445 }
  0xe8   :  { %v211_v58 = vpop.permute.xlu1 %210 }
  0xe9   :  { %v223_v61 = vsel %vm143_vm5, %v173_v60, %v211_v58 }
  0xec   :  { %v219_v0 = vpop.permute.xlu0 %218  ;;  %v448_v1 = vpop.permute.xlu1 %447 }
  0xed   :  { %v225_v4 = vsel %vm80_vm4, %v223_v61, %v219_v0  ;;  %v454_v21 = vsel %vm449_vm10, %v448_v1, %v446_v31  ;;  %v450_v20 = vsel %vm449_vm10, %v446_v31, %v448_v1 }
  0xee   :  { %1245 = vmatmul.mubr.msk.f32.gmra.mrb[2].mxu0 %vm226_vm6, %v225_v4  ;;  %v464_v22 = vmul.f32 %v1641_v6, %v454_v21  ;;  %v463_v27 = vmul.f32 %v1650_v19, %v450_v20  ;;  %v44_v21 = vld [vmem:[%s1990_s3] sm:$0xff]  ;;  %v803_v20 = vsel %vm143_vm5, %v632_v10, 0.0 }
  0xef   :  { %380 = vmatprep.mubr.f32.mxu0 %v1350_v8 }
  0xf0   :  { %v132_v7 = vpop.permute.xlu0 %131  ;;  %v140_v9 = vpop.permute.xlu1 %139 }
  0xf1   :  { %v145_v23 = vsel %vm143_vm5, %v74_v12, %v132_v7 }
  0xf2   :  { %1246 = vmatmul.mubr.msk.f32.vlgmr.msra.gmra.mrb[0].mxu0 %vm226_vm6, %v146_v11  ;;  %v147_v28 = vsel %vm80_vm4, %v145_v23, %v140_v9  ;;  %v45_v11 = vld [vmem:[%s1991_s4] sm:$0xff] }
  0xf3   :  { %1269 = vmatpush1.bf16.msra.mxu0 %v1268_v55  ;;  %386 = vmatprep.mubr.f32.mxu0 %v1350_v8  ;;  %v631_v55 = vld [vmem:[%s1989_s5 + $0x20] sm:$0xff] }
  0xf4   :  { %501 = vmatprep.subr.mxu0 %v464_v22  ;;  %v474_v25 = vpop.permute.xlu0 %473  ;;  %v482_v26 = vpop.permute.xlu1 %481 }
  0xf5   :  { %v487_v16 = vsel %vm143_vm5, %v413_v24, %v474_v25  ;;  %v628_v24 = vld [vmem:[%s1989_s5 + $0x8] sm:$0xff] }
  0xf6   :  { %1247 = vmatmul.mubr.msk.f32.gmra.mrb[2].mxu0 %vm226_vm6, %v147_v28  ;;  %v489_v47 = vsel %vm80_vm4, %v487_v16, %v482_v26  ;;  %v629_v26 = vld [vmem:[%s1989_s5 + $0x10] sm:$0xff]  ;;  %v1723_v28 = vld [vmem:[%s1989_s5 + $0x38] sm:$0xff]  ;;  %v1728_v16 = vld [vmem:[%s1989_s5] sm:$0xff] }
  0xf7   :  { %502 = vmatpush1.msra.mxu0 %v463_v27  ;;  %561 = vmatprep.mubr.f32.mxu0 %v1350_v8  ;;  %v692_v27 = vsel %vm143_vm5, %v628_v24, 0.0 }
  0xf8   :  { %v416_v29 = vpop.permute.xlu0 %415  ;;  %v476_v34 = vpop.permute.xlu1 %475 }
  0xf9   :  { %v418_v33 = vsel %vm68_vm0, 0.0, %v416_v29  ;;  %v1737_v29 = vld [vmem:[%s1989_s5 + $0x40] sm:$0xff] }
  0xfa   :  { %1250 = vmatmul.mubr.msk.f32.vlgmr.msra.gmra.mrb[0].mxu0 %vm226_vm6, %v489_v47  ;;  %v488_v37 = vsel %vm143_vm5, %v418_v33, %v476_v34  ;;  %v775_v47 = vsel %vm143_vm5, %v631_v55, 0.0  ;;  %v1746_v33 = vld [vmem:[%s1989_s5 + $0x18] sm:$0xff] }
  0xfb   :  { %567 = vmatprep.mubr.f32.mxu0 %v1350_v8 }
  0xfc   :  { %v484_v38 = vpop.permute.xlu0 %483 }
  0xfd   :  { %v490_v39 = vsel %vm80_vm4, %v488_v37, %v484_v38  ;;  %v720_v38 = vsel %vm143_vm5, %v629_v26, 0.0 }
  0xfe   :  { %1251 = vmatmul.mubr.msk.f32.gmra.mrb[2].mxu0 %vm226_vm6, %v490_v39 }
  0xff   :  { %1170 = vmatprep.mubr.f32.mxu0 %v1350_v8 }
 0x1cd   :  { %v1672_v40 = vpop.f32.mrb[0].mxu0 }
 0x1ce   :  { %v1674_v41 = vpop.f32.mrb[1].mxu0  ;;  %v584_v42 = vmul.f32 %v1672_v40, %v1672_v40 }
 0x1cf   :  { %v578_v44 = vadd.f32 %v1674_v41, %v1672_v40  ;;  %v585_v45 = vmul.f32 %v1674_v41, %v1674_v41 }
 0x1d1   :  { %579 = vadd.xlane.f32.xlu1 %v578_v44  ;;  %v1682_v48 = vpop.f32.mrb[2].mxu0  ;;  %v588_v49 = vadd.f32 %v585_v45, %v584_v42 }
 0x1d2   :  { %v1684_v51 = vpop.f32.mrb[3].mxu0  ;;  %v586_v13 = vmul.f32 %v1682_v48, %v1682_v48 }
 0x1d3   :  { %v581_v52 = vadd.f32 %v1684_v51, %v1682_v48  ;;  %v587_v53 = vmul.f32 %v1684_v51, %v1684_v51 }
 0x1d5   :  { %582 = vadd.xlane.f32.xlu0 %v581_v52  ;;  %v591_v54 = vadd.f32 %v587_v53, %v586_v13 }
 0x1d7   :  { %592 = vadd.xlane.f32.xlu1 %v591_v54 }
 0x1d9   :  { %589 = vadd.xlane.f32.xlu0 %v588_v49 }
 0x1e8   :  { %777 = vrot.lane.b32.xlu1 %v631_v55, %s1353_s27 }
 0x1ec   :  { %805 = vrot.lane.b32.xlu1 %v632_v10, %s1353_s27 }
 0x25e   :  { %v580_v57 = vpop.xlane.xlu1 %579 }
 0x262   :  { %v583_v17 = vpop.xlane.xlu0 %582 }
 0x263   :  { %v594_v31 = vadd.f32 %v583_v17, %v580_v57 }
 0x264   :  { %v593_v59 = vpop.xlane.xlu1 %592 }
 0x265   :  { %v596_v58 = vmul.f32 0.001953125, %v594_v31 }
 0x266   :  { %v590_v60 = vpop.xlane.xlu0 %589 }
 0x267   :  { %v595_v61 = vadd.f32 %v593_v59, %v590_v60  ;;  %v598_v0 = vmul.f32 %v596_v58, %v596_v58  ;;  %v1839_v59 = vld [vmem:[%s1989_s5 + $0x30] sm:$0xff]  ;;  %v1046_v60 = vsel %vm143_vm5, %v1723_v28, 0.0 }
 0x268   :  { %v778_v23 = vpop.permute.xlu1 %777 }
 0x269   :  { %v597_v1 = vmul.f32 0.001953125, %v595_v61  ;;  %v780_v25 = vsel %vm143_vm5, 0.0, %v778_v23 }
 0x26b   :  { %v599_v4 = vsub.f32 %v597_v1, %v598_v0  ;;  %v1074_v0 = vsel %vm143_vm5, %v1737_v29, 0.0 }
 0x26c   :  { %v806_v34 = vpop.permute.xlu1 %805 }
 0x26d   :  { %v600_v5 = vadd.f32 1e-05, %v599_v4  ;;  %v808_v37 = vsel %vm143_vm5, 0.0, %v806_v34 }
 0x26f   :  { %1343 = vrsqrt.f32 %v600_v5 }
 0x279   :  { %v1344_v7 = vpop.eup %1343 }
 0x27a   :  { %v602_v9 = vmul.f32 %v1344_v7, %v44_v21 }
 0x27c   :  { %607 = vperm.xlu0 %1341, %v602_v9   ;;  %v603_v12 = vmul.f32 %v602_v9, %v596_v58 }
 0x27e   :  { %v604_v22 = vsub.f32 %v45_v11, %v603_v12 }
 0x280   :  { %616 = vperm.xlu1 %1342, %v604_v22   ;;  %819 = vrot.lane.b32.xlu0 %v803_v20, %s1359_s15 }
 0x284   :  { %694 = vrot.lane.b32.xlu1 %v628_v24, %s1353_s27  ;;  %813 = vrot.lane.b32.xlu0 %v780_v25, %s1352_s24 }
 0x288   :  { %722 = vrot.lane.b32.xlu1 %v629_v26, %s1353_s27  ;;  %728 = vrot.lane.b32.xlu0 %v692_v27, %s1352_s24 }
 0x28c   :  { %1048 = vrot.lane.b32.xlu1 %v1723_v28, %s1353_s27  ;;  %666 = vrot.lane.b32.xlu0 %v1728_v16, %s1353_s27 }
 0x290   :  { %1076 = vrot.lane.b32.xlu1 %v1737_v29, %s1353_s27 }
 0x294   :  { %811 = vrot.lane.b32.xlu1 %v775_v47, %s1352_s24 }
 0x298   :  { %771 = vrot.lane.b32.xlu1 %v1746_v33, %s1353_s27 }
 0x29c   :  { %821 = vrot.lane.b32.xlu1 %v808_v37, %s1359_s15 }
 0x2a0   :  { %736 = vrot.lane.b32.xlu1 %v720_v38, %s1359_s15 }
 0x2fb   :  { %v608_v39 = vpop.permute.xlu0 %607 }
 0x2fc   :  { %v611_v42 = vmul.f32 %v608_v39, %v1674_v41  ;;  %v613_v44 = vmul.f32 %v608_v39, %v1684_v51  ;;  %v612_v49 = vmul.f32 %v608_v39, %v1682_v48  ;;  %v610_v51 = vmul.f32 %v608_v39, %v1672_v40 }
 0x2ff   :  { %v617_v45 = vpop.permute.xlu1 %616  ;;  %v820_v5 = vpop.permute.xlu0 %819 }
 0x300   :  { %v620_v13 = vadd.f32 %v617_v45, %v611_v42  ;;  %v622_v52 = vadd.f32 %v617_v45, %v613_v44  ;;  %v621_v53 = vadd.f32 %v617_v45, %v612_v49  ;;  %v619_v57 = vadd.f32 %v617_v45, %v610_v51 }
 0x302   :  { %v1757_v54 = vmax.f32 %v620_v13, 0.0  ;;  %v1759_v55 = vmax.f32 %v622_v52, 0.0  ;;  %v1768_v48 = vmax.f32 %v621_v53, 0.0  ;;  %v1774_v17 = vmax.f32 %v619_v57, 0.0 }
 0x303   :  { %v695_v56 = vpop.permute.xlu1 %694  ;;  %v814_v7 = vpop.permute.xlu0 %813 }
 0x304   :  { %v697_v10 = vsel %vm143_vm5, 0.0, %v695_v56  ;;  %749 = vrot.lane.b32.xlu0 %v1759_v55, %s1348_s22  ;;  %v1274_v41 = vpack.c.bf16 %v1759_v55, %v1757_v54  ;;  %v1276_v57 = vpack.c.bf16 %v1768_v48, %v1774_v17 }
 0x305   :  { %730 = vrot.lane.b32.xlu1 %v697_v10, %s1352_s24 }
 0x307   :  { %v723_v40 = vpop.permute.xlu1 %722  ;;  %v1853_v11 = vpop.permute.xlu0 %728 }
 0x308   :  { %755 = vrot.lane.b32.xlu0 %v1768_v48, %s1348_s22  ;;  %v725_v31 = vsel %vm143_vm5, 0.0, %v723_v40 }
 0x309   :  { %747 = vrot.lane.b32.xlu1 %v1757_v54, %s1348_s22 }
 0x30b   :  { %v1049_v58 = vpop.permute.xlu1 %1048  ;;  %v1857_v20 = vpop.permute.xlu0 %666 }
 0x30c   :  { %783 = vrot.lane.b32.xlu0 %v1757_v54, %s1349_s23  ;;  %v1051_v61 = vsel %vm143_vm5, 0.0, %v1049_v58 }
 0x30d   :  { %753 = vrot.lane.b32.xlu1 %v1774_v17, %s1348_s22 }
 0x30f   :  { %v1077_v1 = vpop.permute.xlu1 %1076 }
 0x310   :  { %787 = vrot.lane.b32.xlu0 %v1759_v55, %s1349_s23  ;;  %v1079_v4 = vsel %vm143_vm5, 0.0, %v1077_v1 }
 0x311   :  { %781 = vrot.lane.b32.xlu1 %v1774_v17, %s1349_s23 }
 0x313   :  { %v812_v21 = vpop.permute.xlu1 %811 }
 0x314   :  { %642 = vrot.lane.b32.xlu0 %v1759_v55, %s1351_s1 }
 0x315   :  { %785 = vrot.lane.b32.xlu1 %v1768_v48, %s1349_s23 }
 0x317   :  { %v772_v9 = vpop.permute.xlu1 %771 }
 0x318   :  { %650 = vrot.lane.b32.xlu0 %v1768_v48, %s1351_s1 }
 0x319   :  { %640 = vrot.lane.b32.xlu1 %v1757_v54, %s1351_s1 }
 0x31b   :  { %v1855_v12 = vpop.permute.xlu1 %821 }
 0x31c   :  { %672 = vrot.lane.b32.xlu0 %v1759_v55, %s1352_s24 }
 0x31d   :  { %648 = vrot.lane.b32.xlu1 %v1774_v17, %s1351_s1 }
 0x31f   :  { %v1859_v22 = vpop.permute.xlu1 %736 }
 0x320   :  { %678 = vrot.lane.b32.xlu0 %v1768_v48, %s1352_s24 }
 0x321   :  { %670 = vrot.lane.b32.xlu1 %v1757_v54, %s1352_s24 }
 0x324   :  { %700 = vrot.lane.b32.xlu0 %v1759_v55, %s1354_s30 }
 0x325   :  { %676 = vrot.lane.b32.xlu1 %v1774_v17, %s1352_s24 }
 0x328   :  { %706 = vrot.lane.b32.xlu0 %v1768_v48, %s1354_s30 }
 0x329   :  { %698 = vrot.lane.b32.xlu1 %v1757_v54, %s1354_s30 }
 0x32c   :  { %996 = vrot.lane.b32.xlu0 %v1774_v17, %s1355_s10 }
 0x32d   :  { %704 = vrot.lane.b32.xlu1 %v1774_v17, %s1354_s30 }
 0x330   :  { %1000 = vrot.lane.b32.xlu0 %v1768_v48, %s1355_s10 }
 0x331   :  { %998 = vrot.lane.b32.xlu1 %v1757_v54, %s1355_s10 }
 0x334   :  { %1024 = vrot.lane.b32.xlu0 %v1774_v17, %s1356_s11 }
 0x335   :  { %1002 = vrot.lane.b32.xlu1 %v1759_v55, %s1355_s10 }
 0x338   :  { %1028 = vrot.lane.b32.xlu0 %v1768_v48, %s1356_s11 }
 0x339   :  { %1026 = vrot.lane.b32.xlu1 %v1757_v54, %s1356_s11 }
 0x33c   :  { %1054 = vrot.lane.b32.xlu0 %v1757_v54, %s1357_s14  ;;  %v769_v54 = vsel %vm143_vm5, %v1746_v33, 0.0 }
 0x33d   :  { %1030 = vrot.lane.b32.xlu1 %v1759_v55, %s1356_s11  ;;  %v825_v1 = vsel %vm80_vm4, %v769_v54, %v812_v21 }
 0x33e   :  { %v827_v33 = vsel %vm744_vm12, %v825_v1, %v820_v5 }
 0x340   :  { %1058 = vrot.lane.b32.xlu0 %v1759_v55, %s1357_s14 }
 0x341   :  { %1052 = vrot.lane.b32.xlu1 %v1774_v17, %s1357_s14 }
 0x344   :  { %738 = vrot.lane.b32.xlu0 %v725_v31, %s1359_s15 }
 0x345   :  { %1056 = vrot.lane.b32.xlu1 %v1768_v48, %s1357_s14  ;;  %v774_v48 = vsel %vm143_vm5, 0.0, %v772_v9 }
 0x348   :  { %1020 = vrot.lane.b32.xlu0 %v1839_v59, %s1353_s27 }
 0x349   :  { %1082 = vrot.lane.b32.xlu1 %v1046_v60, %s1352_s24 }
 0x34c   :  { %1084 = vrot.lane.b32.xlu0 %v1051_v61, %s1352_s24 }
 0x34d   :  { %1090 = vrot.lane.b32.xlu1 %v1074_v0, %s1359_s15 }
 0x351   :  { %1092 = vrot.lane.b32.xlu1 %v1079_v4, %s1359_s15 }
 0x376   :  { %v750_v23 = vpop.permute.xlu0 %749 }
 0x377   :  { %v1861_v24 = vpop.permute.xlu1 %730 }
 0x37a   :  { %v756_v25 = vpop.permute.xlu0 %755 }
 0x37b   :  { %v748_v26 = vpop.permute.xlu1 %747  ;;  %v758_v27 = vsel %vm153_vm1, %v756_v25, %v750_v23  ;;  %v764_v28 = vsel %vm153_vm1, %v750_v23, %v756_v25  ;;  %v826_v23 = vsel %vm80_vm4, %v774_v48, %v814_v7 }
 0x37c   :  { %v767_v38 = vmul.f32 %v764_v28, %v1539_v36  ;;  %v768_v44 = vmul.f32 %v758_v27, %v1536_v35 }
 0x37e   :  { %v784_v29 = vpop.permute.xlu0 %783 }
 0x37f   :  { %v754_v47 = vpop.permute.xlu1 %753 }
 0x380   :  { %v757_v34 = vsel %vm153_vm1, %v754_v47, %v748_v26  ;;  %v763_v37 = vsel %vm153_vm1, %v748_v26, %v754_v47 }
 0x381   :  { %v765_v39 = vmul.f32 %v763_v37, %v1539_v36  ;;  %v766_v42 = vmul.f32 %v757_v34, %v1536_v35  ;;  %v828_v34 = vsel %vm744_vm12, %v826_v23, %v1855_v12 }
 0x382   :  { %v788_v45 = vpop.permute.xlu0 %787 }
 0x383   :  { %v782_v49 = vpop.permute.xlu1 %781  ;;  %v1270_v13 = vpack.c.bf16 %v768_v44, %v766_v42  ;;  %v1272_v52 = vpack.c.bf16 %v767_v38, %v765_v39 }
 0x384   :  { %v789_v53 = vsel %vm184_vm2, %v782_v49, %v784_v29  ;;  %v797_v56 = vsel %vm184_vm2, %v784_v29, %v782_v49 }
 0x385   :  { %1271 = vmatprep.subr.bf16.mxu1 %v1270_v13  ;;  %v799_v40 = vmul.f32 %v789_v53, %v1561_v50  ;;  %v800_v31 = vmul.f32 %v797_v56, %v1550_v43 }
 0x386   :  { %v643_v10 = vpop.permute.xlu0 %642  ;;  %1273 = vmatpush1.bf16.msra.mxu1 %v1272_v52 }
 0x387   :  { %1275 = vmatprep.subr.bf16.mxu1 %v1274_v41  ;;  %v786_v36 = vpop.permute.xlu1 %785 }
 0x388   :  { %v790_v51 = vsel %vm184_vm2, %v786_v36, %v788_v45  ;;  %v798_v35 = vsel %vm184_vm2, %v788_v45, %v786_v36 }
 0x389   :  { %v801_v58 = vmul.f32 %v790_v51, %v1561_v50  ;;  %v802_v60 = vmul.f32 %v798_v35, %v1550_v43 }
 0x38a   :  { %v651_v55 = vpop.permute.xlu0 %650  ;;  %1277 = vmatpush1.bf16.msra.mxu1 %v1276_v57 }
 0x38b   :  { %v641_v41 = vpop.permute.xlu1 %640  ;;  %v1278_v61 = vpack.c.bf16 %v802_v60, %v800_v31  ;;  %v1280_v0 = vpack.c.bf16 %v801_v58, %v799_v40  ;;  %v653_v17 = vsel %vm53_vm3, %v651_v55, %v643_v10  ;;  %v659_v4 = vsel %vm53_vm3, %v643_v10, %v651_v55 }
 0x38c   :  { %v662_v9 = vmul.f32 %v659_v4, %v1576_v62  ;;  %v663_v26 = vmul.f32 %v653_v17, %v1579_v63  ;;  %v664_v60 = vsel %vm143_vm5, %v1728_v16, 0.0 }
 0x38d   :  { %1279 = vmatprep.subr.bf16.mxu1 %v1278_v61 }
 0x38e   :  { %v673_v50 = vpop.permute.xlu0 %672  ;;  %1281 = vmatpush1.bf16.msra.mxu1 %v1280_v0  ;;  %v742_v0 = vsel %vm80_vm4, %v664_v60, %v1853_v11 }
 0x38f   :  { %v649_v43 = vpop.permute.xlu1 %648 }
 0x390   :  { %v652_v25 = vsel %vm53_vm3, %v649_v43, %v641_v41  ;;  %v658_v21 = vsel %vm53_vm3, %v641_v41, %v649_v43 }
 0x391   :  { %v660_v27 = vmul.f32 %v658_v21, %v1576_v62  ;;  %v661_v28 = vmul.f32 %v652_v25, %v1579_v63  ;;  %1252 = vmatmul.mubr.msk.f32.vlgmr.msra.gmra.mrb[0].mxu1 %vm829_vm11, %v827_v33 }
 0x392   :  { %v679_v29 = vpop.permute.xlu0 %678  ;;  %906 = vmatprep.mubr.f32.mxu1 %v1350_v8 }
 0x393   :  { %v1284_v5 = vpack.c.bf16 %v662_v9, %v660_v27  ;;  %v671_v47 = vpop.permute.xlu1 %670  ;;  %v1282_v7 = vpack.c.bf16 %v663_v26, %v661_v28  ;;  %v681_v37 = vsel %vm80_vm4, %v679_v29, %v673_v50  ;;  %v687_v62 = vsel %vm80_vm4, %v673_v50, %v679_v29 }
 0x394   :  { %v690_v44 = vmul.f32 %v687_v62, %v1585_v2  ;;  %v691_v12 = vmul.f32 %v681_v37, %v1588_v3  ;;  %v669_v37 = vsel %vm143_vm5, 0.0, %v1857_v20 }
 0x395   :  { %1253 = vmatmul.mubr.msk.f32.gmra.mrb[2].mxu1 %vm829_vm11, %v828_v34  ;;  %1283 = vmatprep.subr.bf16.mxu1 %v1282_v7 }
 0x396   :  { %v701_v38 = vpop.permute.xlu0 %700  ;;  %1285 = vmatpush1.bf16.msra.mxu1 %v1284_v5  ;;  %983 = vmatprep.mubr.f32.mxu1 %v1350_v8 }
 0x397   :  { %v677_v63 = vpop.permute.xlu1 %676 }
 0x398   :  { %v680_v39 = vsel %vm80_vm4, %v677_v63, %v671_v47  ;;  %v686_v42 = vsel %vm80_vm4, %v671_v47, %v677_v63 }
 0x399   :  { %v688_v45 = vmul.f32 %v686_v42, %v1585_v2  ;;  %v689_v49 = vmul.f32 %v680_v39, %v1588_v3  ;;  %v743_v39 = vsel %vm80_vm4, %v669_v37, %v1861_v24 }
 0x39a   :  { %v707_v13 = vpop.permute.xlu0 %706 }
 0x39b   :  { %v1288_v52 = vpack.c.bf16 %v690_v44, %v688_v45  ;;  %v699_v53 = vpop.permute.xlu1 %698  ;;  %v1286_v56 = vpack.c.bf16 %v691_v12, %v689_v49  ;;  %v709_v10 = vsel %vm106_vm7, %v707_v13, %v701_v38  ;;  %v715_v36 = vsel %vm106_vm7, %v701_v38, %v707_v13 }
 0x39c   :  { %v718_v2 = vmul.f32 %v715_v36, %v1604_v30  ;;  %v719_v3 = vmul.f32 %v709_v10, %v1607_v32 }
 0x39d   :  { %1287 = vmatprep.subr.bf16.mxu1 %v1286_v56 }
 0x39e   :  { %v997_v51 = vpop.permute.xlu0 %996  ;;  %1289 = vmatpush1.bf16.msra.mxu1 %v1288_v52 }
 0x39f   :  { %v705_v35 = vpop.permute.xlu1 %704 }
 0x3a0   :  { %v708_v57 = vsel %vm106_vm7, %v705_v35, %v699_v53  ;;  %v714_v40 = vsel %vm106_vm7, %v699_v53, %v705_v35 }
 0x3a1   :  { %v716_v31 = vmul.f32 %v714_v40, %v1604_v30  ;;  %v717_v58 = vmul.f32 %v708_v57, %v1607_v32  ;;  %v745_v32 = vsel %vm744_vm12, %v742_v0, %v1859_v22 }
 0x3a2   :  { %v1001_v54 = vpop.permute.xlu0 %1000 }
 0x3a3   :  { %v1292_v55 = vpack.c.bf16 %v718_v2, %v716_v31  ;;  %v999_v41 = vpop.permute.xlu1 %998  ;;  %v1290_v61 = vpack.c.bf16 %v719_v3, %v717_v58 }
 0x3a4   :  { %v1004_v1 = vsel %vm397_vm8, %v997_v51, %v999_v41  ;;  %v1012_v48 = vsel %vm397_vm8, %v999_v41, %v997_v51  ;;  %v1018_v51 = vsel %vm143_vm5, %v1839_v59, 0.0 }
 0x3a5   :  { %1291 = vmatprep.subr.bf16.mxu1 %v1290_v61  ;;  %v1014_v50 = vmul.f32 %v1004_v1, %v1478_v15  ;;  %v1015_v43 = vmul.f32 %v1012_v48, %v1616_v14 }
 0x3a6   :  { %v1025_v17 = vpop.permute.xlu0 %1024  ;;  %1293 = vmatpush1.bf16.msra.mxu1 %v1292_v55 }
 0x3a7   :  { %v1003_v30 = vpop.permute.xlu1 %1002 }
 0x3a8   :  { %v1005_v16 = vsel %vm397_vm8, %v1001_v54, %v1003_v30  ;;  %v1013_v4 = vsel %vm397_vm8, %v1003_v30, %v1001_v54 }
 0x3a9   :  { %v1016_v11 = vmul.f32 %v1005_v16, %v1478_v15  ;;  %v1017_v33 = vmul.f32 %v1013_v4, %v1616_v14  ;;  %1254 = vmatmul.mubr.msk.f32.vlgmr.msra.gmra.mrb[0].mxu1 %vm829_vm11, %v745_v32 }
 0x3aa   :  { %v1029_v23 = vpop.permute.xlu0 %1028  ;;  %989 = vmatprep.mubr.f32.mxu1 %v1350_v8 }
 0x3ab   :  { %v1296_v25 = vpack.c.bf16 %v1016_v11, %v1014_v50  ;;  %v1027_v21 = vpop.permute.xlu1 %1026  ;;  %v1294_v22 = vpack.c.bf16 %v1017_v33, %v1015_v43 }
 0x3ac   :  { %v1032_v9 = vsel %vm423_vm9, %v1025_v17, %v1027_v21  ;;  %v1040_v26 = vsel %vm423_vm9, %v1027_v21, %v1025_v17 }
 0x3ad   :  { %1295 = vmatprep.subr.bf16.mxu0 %v1294_v22  ;;  %1306 = vmatprep.subr.bf16.mxu1 %v1294_v22  ;;  %v1042_v29 = vmul.f32 %v1032_v9, %v1493_v18  ;;  %v1043_v5 = vmul.f32 %v1040_v26, %v1623_v46 }
 0x3ae   :  { %v1055_v27 = vpop.permute.xlu0 %1054  ;;  %1297 = vmatpush1.bf16.msra.mxu0 %v1296_v25  ;;  %1309 = vmatpush1.bf16.msra.mxu1 %v1296_v25 }
 0x3af   :  { %v1031_v15 = vpop.permute.xlu1 %1030 }
 0x3b0   :  { %v1033_v14 = vsel %vm423_vm9, %v1029_v23, %v1031_v15  ;;  %v1041_v28 = vsel %vm423_vm9, %v1031_v15, %v1029_v23  ;;  %v636_v15 = vld [vmem:[%s1992_s6] sm:$0xff] }
 0x3b1   :  { %v1044_v47 = vmul.f32 %v1033_v14, %v1493_v18  ;;  %v1045_v7 = vmul.f32 %v1041_v28, %v1623_v46 }
 0x3b2   :  { %v1059_v34 = vpop.permute.xlu0 %1058 }
 0x3b3   :  { %v1300_v62 = vpack.c.bf16 %v1044_v47, %v1042_v29  ;;  %v1053_v38 = vpop.permute.xlu1 %1052  ;;  %v1298_v63 = vpack.c.bf16 %v1045_v7, %v1043_v5  ;;  %v637_v29 = vld [vmem:[%s1993_s7] sm:$0xff] }
 0x3b4   :  { %v1060_v42 = vsel %vm449_vm10, %v1053_v38, %v1055_v27  ;;  %v1068_v44 = vsel %vm449_vm10, %v1055_v27, %v1053_v38 }
 0x3b5   :  { %1299 = vmatprep.subr.bf16.mxu0 %v1298_v63  ;;  %1307 = vmatprep.subr.bf16.mxu1 %v1298_v63  ;;  %v1070_v49 = vmul.f32 %v1650_v19, %v1060_v42  ;;  %v1071_v24 = vmul.f32 %v1641_v6, %v1068_v44 }
 0x3b6   :  { %v739_v12 = vpop.permute.xlu0 %738  ;;  %1301 = vmatpush1.bf16.msra.mxu0 %v1300_v62  ;;  %1310 = vmatpush1.bf16.msra.mxu1 %v1300_v62 }
 0x3b7   :  { %v746_v18 = vsel %vm744_vm12, %v743_v39, %v739_v12  ;;  %v1057_v46 = vpop.permute.xlu1 %1056 }
 0x3b8   :  { %v1061_v20 = vsel %vm449_vm10, %v1057_v46, %v1059_v34  ;;  %v1069_v45 = vsel %vm449_vm10, %v1059_v34, %v1057_v46  ;;  %1255 = vmatmul.mubr.msk.f32.gmra.mrb[2].mxu1 %vm829_vm11, %v746_v18 }
 0x3b9   :  { %v1072_v13 = vmul.f32 %v1650_v19, %v1061_v20  ;;  %v1073_v52 = vmul.f32 %v1641_v6, %v1069_v45  ;;  %1176 = vmatprep.mubr.f32.mxu1 %v1350_v8 }
 0x3ba   :  { %v1021_v53 = vpop.permute.xlu0 %1020 }
 0x3bb   :  { %v1304_v56 = vpack.c.bf16 %v1072_v13, %v1070_v49  ;;  %v1083_v10 = vpop.permute.xlu1 %1082  ;;  %v1302_v36 = vpack.c.bf16 %v1073_v52, %v1071_v24  ;;  %v1023_v35 = vsel %vm143_vm5, 0.0, %v1021_v53 }
 0x3bc   :  { %v1096_v19 = vsel %vm80_vm4, %v1018_v51, %v1083_v10 }
 0x3bd   :  { %1303 = vmatprep.subr.bf16.mxu0 %v1302_v36  ;;  %1308 = vmatprep.subr.bf16.mxu1 %v1302_v36 }
 0x3be   :  { %1305 = vmatpush1.bf16.msra.mxu0 %v1304_v56  ;;  %1311 = vmatpush1.bf16.msra.mxu1 %v1304_v56  ;;  %v1085_v57 = vpop.permute.xlu0 %1084 }
 0x3bf   :  { %v1091_v40 = vpop.permute.xlu1 %1090  ;;  %v1097_v8 = vsel %vm80_vm4, %v1023_v35, %v1085_v57 }
 0x3c0   :  { %v1098_v6 = vsel %vm744_vm12, %v1096_v19, %v1091_v40 }
 0x3c1   :  { %1256 = vmatmul.mubr.msk.f32.vlgmr.msra.gmra.mrb[4].mxu0 %vm829_vm11, %v1098_v6 }
 0x3c3   :  { %v1093_v2 = vpop.permute.xlu1 %1092 }
 0x3c4   :  { %v1099_v3 = vsel %vm744_vm12, %v1097_v8, %v1093_v2 }
 0x3c5   :  { %1257 = vmatmul.mubr.msk.f32.vlgmr.msra.gmra.mrb[2].mxu1 %vm829_vm11, %v1099_v3 }
 0x47c   :  { %v985_v59 = vpop.f32.mrb[0].mxu1 }
 0x47d   :  { %v987_v31 = vpop.f32.mrb[1].mxu1 }
 0x494   :  { %v1172_v58 = vpop.f32.mrb[4].mxu0 }
 0x495   :  { %v1312_v60 = vadd.f32 %v1172_v58, %v985_v59  ;;  %v1174_v54 = vpop.f32.mrb[5].mxu0 }
 0x496   :  { %v1313_v55 = vadd.f32 %v1174_v54, %v987_v31 }
 0x497   :  { %v1193_v0 = vmul.f32 %v1312_v60, %v1312_v60 }
 0x498   :  { %v1178_v41 = vpop.f32.mrb[2].mxu1  ;;  %v1187_v61 = vadd.f32 %v1313_v55, %v1312_v60  ;;  %v1194_v1 = vmul.f32 %v1313_v55, %v1313_v55 }
 0x499   :  { %v1180_v48 = vpop.f32.mrb[3].mxu1  ;;  %v1195_v17 = vmul.f32 %v1178_v41, %v1178_v41 }
 0x49a   :  { %v1190_v30 = vadd.f32 %v1180_v48, %v1178_v41  ;;  %v1196_v32 = vmul.f32 %v1180_v48, %v1180_v48  ;;  %1188 = vadd.xlane.f32.xlu0 %v1187_v61  ;;  %v1197_v16 = vadd.f32 %v1194_v1, %v1193_v0 }
 0x49c   :  { %1191 = vadd.xlane.f32.xlu1 %v1190_v30  ;;  %v1200_v4 = vadd.f32 %v1196_v32, %v1195_v17 }
 0x49e   :  { %1198 = vadd.xlane.f32.xlu0 %v1197_v16 }
 0x4a2   :  { %1201 = vadd.xlane.f32.xlu0 %v1200_v4 }
 0x527   :  { %v1189_v50 = vpop.xlane.xlu0 %1188 }
 0x529   :  { %v1192_v43 = vpop.xlane.xlu1 %1191 }
 0x52a   :  { %v1203_v11 = vadd.f32 %v1192_v43, %v1189_v50 }
 0x52b   :  { %v1199_v33 = vpop.xlane.xlu0 %1198 }
 0x52c   :  { %v1205_v23 = vmul.f32 0.001953125, %v1203_v11 }
 0x52e   :  { %v1207_v22 = vmul.f32 %v1205_v23, %v1205_v23 }
 0x52f   :  { %v1202_v25 = vpop.xlane.xlu0 %1201 }
 0x530   :  { %v1204_v21 = vadd.f32 %v1202_v25, %v1199_v33 }
 0x532   :  { %v1206_v9 = vmul.f32 0.001953125, %v1204_v21 }
 0x534   :  { %v1208_v26 = vsub.f32 %v1206_v9, %v1207_v22 }
 0x536   :  { %v1209_v27 = vadd.f32 1e-05, %v1208_v26 }
 0x538   :  { %1345 = vrsqrt.f32 %v1209_v27 }
 0x542   :  { %v1346_v14 = vpop.eup %1345 }
 0x543   :  { %v1211_v28 = vmul.f32 %v1346_v14, %v636_v15 }
 0x545   :  { %1216 = vperm.xlu1 %1342, %v1211_v28   ;;  %v1212_v5 = vmul.f32 %v1211_v28, %v1205_v23 }
 0x547   :  { %v1213_v47 = vsub.f32 %v637_v29, %v1212_v5 }
 0x549   :  { %1225 = vperm.xlu0 %1341, %v1213_v47  }
 0x5c4   :  { %v1217_v7 = vpop.permute.xlu1 %1216 }
 0x5c5   :  { %v1219_v34 = vmul.f32 %v1312_v60, %v1217_v7  ;;  %v1220_v37 = vmul.f32 %v1313_v55, %v1217_v7  ;;  %v1221_v62 = vmul.f32 %v1217_v7, %v1178_v41  ;;  %v1222_v38 = vmul.f32 %v1217_v7, %v1180_v48 }
 0x5c8   :  { %v1226_v63 = vpop.permute.xlu0 %1225 }
 0x5c9   :  { %v1228_v39 = vadd.f32 %v1226_v63, %v1219_v34  ;;  %v1229_v42 = vadd.f32 %v1226_v63, %v1220_v37  ;;  %v1230_v44 = vadd.f32 %v1226_v63, %v1221_v62  ;;  %v1231_v12 = vadd.f32 %v1226_v63, %v1222_v38 }
 0x5cb   :  { %v1232_v18 = vmax.f32 %v1228_v39, 0.0  ;;  %v1233_v46 = vmax.f32 %v1229_v42, 0.0  ;;  %v1234_v20 = vmax.f32 %v1230_v44, 0.0  ;;  %v1235_v45 = vmax.f32 %v1231_v12, 0.0 }
 0x5cd   :  { %1236 = vst [vmem:[%s1994_s8] sm:$0xff] %v1232_v18  ;;  %1237 = vst [vmem:[%s1994_s8 + $0x8] sm:$0xff] %v1233_v46 }
 0x5ce   :  { %1238 = vst [vmem:[%s1994_s8 + $0x10] sm:$0xff] %v1234_v20  ;;  %1239 = vst [vmem:[%s1994_s8 + $0x18] sm:$0xff] %v1235_v45 }

</bundles_post_ra>
